<compile_context>
chip_gen: v7x
topology: tpu7x:2x2x1
jax: 0.10.0
libtpu: 0.0.40
codegen_flags: <defaults>
</compile_context>

<pallas_src>
import math

import jax
import jax.numpy as jnp
import numpy as np
from jax import lax
from jax.experimental import pallas as pl
from jax.experimental.pallas import tpu as pltpu


# ----------------------------- model config ---------------------------------
B = 2            # batch
T = 8            # sequence length
C = 32           # n_embd (real)
CP = 128         # lane-padded n_embd
N_HEAD = 4
HEAD_DIM = C // N_HEAD
HID = 4 * C      # MLP hidden (= 128, already lane-dense)
N_LAYER = 2
VOCAB = 512      # multiple of 128 -> lane-dense logits

RMS_EPS = float(jnp.finfo(jnp.float32).eps)   # nn.RMSNorm(eps=None) on f32 inputs
LN_EPS = 1e-5                                 # nn.LayerNorm default


# ----------------------------- fused Pallas kernel ---------------------------
def make_gpt_kernel(seq, n_embd, n_head, n_layer, c_pad):
    inv_c = 1.0 / n_embd
    bf16 = jnp.bfloat16
    f32 = jnp.float32

    def kernel(x_ref, cos_ref, sin_ref, mask_ref, hmask_ref, cmask_ref,
               anw_ref, wqkvr_ref, bqkvr_ref, wo_ref, bo_ref,
               fnw_ref, wfc_ref, bfc_ref, wpr_ref, bpr_ref,
               lng_ref, lnb_ref, wte_t_ref, out_ref):
        x = x_ref[...]                # (T, CP) f32 residual stream; padded lanes stay 0
        cosf = cos_ref[...]           # (T, CP)
        sinf = sin_ref[...]
        bias = mask_ref[...]          # (T, T) additive causal mask
        hm = hmask_ref[...]           # (n_head, CP) 0/1 head-lane masks
        head_masks = [hm[i:i + 1, :] for i in range(n_head)]   # hoisted out of loops

        for l in range(n_layer):      # tiny static layer count -> fully unrolled
            # ---------------- attention branch ----------------
            ms = jnp.sum(x * x, axis=-1, keepdims=True) * inv_c      # mean over real C
            h = x * lax.rsqrt(ms + RMS_EPS) * anw_ref[l]             # RMSNorm (weight only)

            # one matmul -> q (pre-scaled), k, v, rot(q) (pre-scaled), rot(k);
            # each chunk occupies its own 128-lane block.
            qkvr = jnp.dot(h.astype(bf16), wqkvr_ref[l],
                           preferred_element_type=f32) + bqkvr_ref[l]   # (T, 5*CP)
            q = qkvr[:, 0 * c_pad:1 * c_pad] * cosf + qkvr[:, 3 * c_pad:4 * c_pad] * sinf
            k = qkvr[:, 1 * c_pad:2 * c_pad] * cosf + qkvr[:, 4 * c_pad:5 * c_pad] * sinf
            v = qkvr[:, 2 * c_pad:3 * c_pad]

            kb = k.astype(bf16)
            vb = v.astype(bf16)

            # head-masked attention in the merged (T, CP) layout -- no split/merge.
            ctx = None
            for i in range(n_head):
                qh = (q * head_masks[i]).astype(bf16)                      # (T, CP)
                s = lax.dot_general(qh, kb, (((1,), (1,)), ((), ())),
                                    preferred_element_type=f32) + bias     # (T, T)
                m = jnp.max(s, axis=-1, keepdims=True)
                p = jnp.exp(s - m)
                p = p / jnp.sum(p, axis=-1, keepdims=True)                 # exact softmax
                ctx_h = jnp.dot(p.astype(bf16), vb,
                                preferred_element_type=f32)                # (T, CP)
                ch = ctx_h * head_masks[i]
                ctx = ch if ctx is None else ctx + ch

            y = jnp.dot(ctx.astype(bf16), wo_ref[l],
                        preferred_element_type=f32) + bo_ref[l]
            x = x + y

            # ---------------- MLP branch ----------------
            ms2 = jnp.sum(x * x, axis=-1, keepdims=True) * inv_c
            h2 = x * lax.rsqrt(ms2 + RMS_EPS) * fnw_ref[l]
            f = jnp.dot(h2.astype(bf16), wfc_ref[l],
                        preferred_element_type=f32) + bfc_ref[l]           # (T, HID)
            f = f * jax.nn.sigmoid(f)                                      # SiLU (f32)
            x = x + jnp.dot(f.astype(bf16), wpr_ref[l],
                            preferred_element_type=f32) + bpr_ref[l]

        # ---------------- final LayerNorm + tied lm_head ----------------
        cmask = cmask_ref[...]                                             # (1, CP)
        mu = jnp.sum(x, axis=-1, keepdims=True) * inv_c
        xc = (x - mu) * cmask                    # zero padded lanes before variance
        var = jnp.sum(xc * xc, axis=-1, keepdims=True) * inv_c
        hf = xc * lax.rsqrt(var + LN_EPS) * lng_ref[...] + lnb_ref[...]
        # lane-dense (T, VOCAB) output slab, single unmasked-store block
        out_ref[...] = jnp.dot(hf.astype(bf16), wte_t_ref[...],
                               preferred_element_type=f32)

    return kernel


def gpt_pallas(x_pad, pk):
    V = pk["wte_t"].shape[1]
    kernel = make_gpt_kernel(T, C, N_HEAD, N_LAYER, CP)

    args = (x_pad, pk["cos"], pk["sin"], pk["mask"], pk["hmask"], pk["cmask"],
            pk["anw"], pk["wqkvr"], pk["bqkvr"], pk["wo"], pk["bo"],
            pk["fnw"], pk["wfc"], pk["bfc"], pk["wpr"], pk["bpr"],
            pk["lng"], pk["lnb"], pk["wte_t"])

    def fixed_spec(shape):
        # whole-array block, same block index at every grid step (stays VMEM-resident)
        if len(shape) == 2:
            return pl.BlockSpec(shape, lambda b: (0, 0))
        return pl.BlockSpec(shape, lambda b: (0, 0, 0))

    in_specs = [pl.BlockSpec((T, CP), lambda b: (b, 0))]    # residual rows per batch elem
    in_specs += [fixed_spec(a.shape) for a in args[1:]]

    return pl.pallas_call(
        kernel,
        grid=(B,),
        out_shape=jax.ShapeDtypeStruct((B * T, V), jnp.float32),
        in_specs=in_specs,
        out_specs=pl.BlockSpec((T, V), lambda b: (b, 0)),
        compiler_params=pltpu.CompilerParams(
            dimension_semantics=("parallel",),          # batch elems -> both TCs on v7x
            vmem_limit_bytes=32 * 1024 * 1024),         # headroom vs v5e/v6e scoped default
    )(*args)


# ----------------------------- parameter init --------------------------------
def xavier_uniform(key, fan_in, fan_out):
    bound = math.sqrt(6.0 / (fan_in + fan_out))
    return jax.random.uniform(key, (fan_in, fan_out), jnp.float32, -bound, bound)


def init_params(key):
    keys = jax.random.split(key, 1 + 4 * N_LAYER)
    wte = 0.02 * jax.random.normal(keys[0], (VOCAB, C), jnp.float32)
    blocks = []
    for l in range(N_LAYER):
        k0, k1, k2, k3 = keys[1 + 4 * l:1 + 4 * (l + 1)]
        blocks.append(dict(
            attn_norm_w=jnp.ones((1, C), jnp.float32),
            wqkv=xavier_uniform(k0, C, 3 * C),
            bqkv=jnp.zeros((1, 3 * C), jnp.float32),
            wo=xavier_uniform(k1, C, C),
            bo=jnp.zeros((1, C), jnp.float32),
            ffn_norm_w=jnp.ones((1, C), jnp.float32),
            wfc=xavier_uniform(k2, C, 4 * C),
            bfc=jnp.zeros((1, 4 * C), jnp.float32),
            wpr=xavier_uniform(k3, 4 * C, C),
            bpr=jnp.zeros((1, C), jnp.float32),
        ))
    ln_f_g = jnp.ones((1, C), jnp.float32)
    ln_f_b = jnp.zeros((1, C), jnp.float32)
    return wte, blocks, ln_f_g, ln_f_b


def rope_tables(seq_len, head_dim):
    # Mirrors torch: bf16 inv_freq / positions, emb = cat(freqs, freqs), cos/sin in bf16.
    inv_freq = 1.0 / (10000.0 ** (jnp.arange(0, head_dim, 2, dtype=jnp.bfloat16) / head_dim))
    t = jnp.arange(seq_len, dtype=jnp.bfloat16)
    freqs = jnp.outer(t, inv_freq)
    emb = jnp.concatenate([freqs, freqs], axis=-1)
    cos = jnp.cos(emb).astype(jnp.float32)
    sin = jnp.sin(emb).astype(jnp.float32)
    return cos, sin


def pack_params(wte, blocks, ln_f_g, ln_f_b, cos, sin):
    """Host-side packing: stack layers, fold rotate_half + softmax scale into c_attn,
    lane-pad everything C->CP, cast matmul weights to bf16, build masks."""
    hd = HEAD_DIM
    scale = 1.0 / math.sqrt(hd)

    # Reference rotate_half (interleaved: out[2i] = -x[2i+1], out[2i+1] = x[2i]) as a
    # signed permutation, block-diagonal over heads -> exact fold into weight columns.
    Rm = np.zeros((hd, hd), np.float32)
    for i in range(hd // 2):
        Rm[2 * i + 1, 2 * i] = -1.0
        Rm[2 * i, 2 * i + 1] = 1.0
    R_C = jnp.asarray(np.kron(np.eye(N_HEAD, dtype=np.float32), Rm))   # (C, C)

    def pad2(a, rows, cols):
        return jnp.zeros((rows, cols), a.dtype).at[:a.shape[0], :a.shape[1]].set(a)

    wqkvr_l, bqkvr_l = [], []
    anw_l, fnw_l = [], []
    wo_l, bo_l, wfc_l, bfc_l, wpr_l, bpr_l = [], [], [], [], [], []
    for blk in blocks:
        wqkv, bqkv = blk["wqkv"], blk["bqkv"]
        Wq, Wk, Wv = wqkv[:, :C], wqkv[:, C:2 * C], wqkv[:, 2 * C:3 * C]
        bq, bk, bv = bqkv[:, :C], bqkv[:, C:2 * C], bqkv[:, 2 * C:3 * C]
        # softmax scale folded into q / rot(q); each chunk padded to its own 128 lanes.
        w_chunks = [Wq * scale, Wk, Wv, (Wq @ R_C) * scale, Wk @ R_C]
        b_chunks = [bq * scale, bk, bv, (bq @ R_C) * scale, bk @ R_C]
        wqkvr_l.append(jnp.concatenate([pad2(w, CP, CP) for w in w_chunks], axis=1))
        bqkvr_l.append(jnp.concatenate([pad2(bb, 1, CP) for bb in b_chunks], axis=1))
        anw_l.append(pad2(blk["attn_norm_w"], 1, CP))
        fnw_l.append(pad2(blk["ffn_norm_w"], 1, CP))
        wo_l.append(pad2(blk["wo"], CP, CP))
        bo_l.append(pad2(blk["bo"], 1, CP))
        wfc_l.append(pad2(blk["wfc"], CP, HID))
        bfc_l.append(blk["bfc"])                      # (1, HID) already lane-dense
        wpr_l.append(pad2(blk["wpr"], HID, CP))
        bpr_l.append(pad2(blk["bpr"], 1, CP))

    cos_c = pad2(jnp.tile(cos, (1, N_HEAD)), T, CP)   # (T, CP), padded lanes zero
    sin_c = pad2(jnp.tile(sin, (1, N_HEAD)), T, CP)

    tril = np.tril(np.ones((T, T), dtype=bool))
    mask = jnp.asarray(np.where(tril, 0.0, -1e30).astype(np.float32))

    hmask = np.zeros((N_HEAD, CP), np.float32)
    for h in range(N_HEAD):
        hmask[h, h * hd:(h + 1) * hd] = 1.0
    cmask = np.zeros((1, CP), np.float32)
    cmask[0, :C] = 1.0

    bf = jnp.bfloat16
    st = lambda lst: jnp.stack(lst, axis=0)
    return dict(
        cos=cos_c, sin=sin_c, mask=mask,
        hmask=jnp.asarray(hmask), cmask=jnp.asarray(cmask),
        anw=st(anw_l), fnw=st(fnw_l),
        wqkvr=st(wqkvr_l).astype(bf), bqkvr=st(bqkvr_l),
        wo=st(wo_l).astype(bf), bo=st(bo_l),
        wfc=st(wfc_l).astype(bf), bfc=st(bfc_l),
        wpr=st(wpr_l).astype(bf), bpr=st(bpr_l),
        lng=pad2(ln_f_g, 1, CP), lnb=pad2(ln_f_b, 1, CP),
        wte_t=pad2(wte.T, CP, VOCAB).astype(bf),      # (CP, VOCAB) for tied lm_head
    )


# ----------------------------- full forward ----------------------------------
@jax.jit
def gpt_forward(idx, wte, packed):
    Bq, Tq = idx.shape
    x = jnp.take(wte, idx, axis=0).reshape(Bq * Tq, C)                # embedding gather (glue)
    x_pad = jnp.zeros((Bq * Tq, CP), jnp.float32).at[:, :C].set(x)    # lane-pad residual
    logits_flat = gpt_pallas(x_pad, packed)                           # fused blocks + ln_f + lm_head
    return logits_flat.reshape(Bq, Tq, VOCAB)
    # TODO(synk): cross-entropy loss (targets) and KV-cache generation path not kernelized.


if __name__ == "__main__":
    key = jax.random.PRNGKey(0)
    pkey, dkey = jax.random.split(key)
    wte, blocks, ln_f_g, ln_f_b = init_params(pkey)
    cos, sin = rope_tables(T, HEAD_DIM)
    packed = pack_params(wte, blocks, ln_f_g, ln_f_b, cos, sin)

    idx = jax.random.randint(dkey, (B, T), 0, VOCAB, dtype=jnp.int32)

    logits = gpt_forward(idx, wte, packed)
    jax.block_until_ready(logits)
    assert logits.shape == (B, T, VOCAB) and logits.dtype == jnp.float32
    assert bool(jnp.all(jnp.isfinite(logits)))
    print("KERNEL_OK")
</pallas_src>

<mosaic_0001>
module attributes {stable_mosaic.version = 11 : i64} {
  func.func @kernel(%arg0: i32, %arg1: memref<8x128xf32, #tpu.memory_space<vmem>>, %arg2: memref<8x128xf32, #tpu.memory_space<vmem>>, %arg3: memref<8x128xf32, #tpu.memory_space<vmem>>, %arg4: memref<8x8xf32, #tpu.memory_space<vmem>>, %arg5: memref<4x128xf32, #tpu.memory_space<vmem>>, %arg6: memref<1x128xf32, #tpu.memory_space<vmem>>, %arg7: memref<2x1x128xf32, #tpu.memory_space<vmem>>, %arg8: memref<2x128x640xbf16, #tpu.memory_space<vmem>>, %arg9: memref<2x1x640xf32, #tpu.memory_space<vmem>>, %arg10: memref<2x128x128xbf16, #tpu.memory_space<vmem>>, %arg11: memref<2x1x128xf32, #tpu.memory_space<vmem>>, %arg12: memref<2x1x128xf32, #tpu.memory_space<vmem>>, %arg13: memref<2x128x128xbf16, #tpu.memory_space<vmem>>, %arg14: memref<2x1x128xf32, #tpu.memory_space<vmem>>, %arg15: memref<2x128x128xbf16, #tpu.memory_space<vmem>>, %arg16: memref<2x1x128xf32, #tpu.memory_space<vmem>>, %arg17: memref<1x128xf32, #tpu.memory_space<vmem>>, %arg18: memref<1x128xf32, #tpu.memory_space<vmem>>, %arg19: memref<128x512xbf16, #tpu.memory_space<vmem>>, %arg20: memref<8x512xf32, #tpu.memory_space<vmem>>) attributes {dimension_semantics = [#tpu.dimension_semantics<parallel>], iteration_bounds = array<i64: 2>, scalar_prefetch = 0 : i64, scratch_operands = 0 : i64, tpu.core_type = #tpu.core_type<tc>, window_params = [{transform_indices = @transform_0, window_bounds = array<i64: 8, 128>}, {pipeline_mode = #tpu.pipeline_mode<synchronous>, transform_indices = @transform_1, window_bounds = array<i64: 8, 128>}, {pipeline_mode = #tpu.pipeline_mode<synchronous>, transform_indices = @transform_2, window_bounds = array<i64: 8, 128>}, {pipeline_mode = #tpu.pipeline_mode<synchronous>, transform_indices = @transform_3, window_bounds = array<i64: 8, 8>}, {pipeline_mode = #tpu.pipeline_mode<synchronous>, transform_indices = @transform_4, window_bounds = array<i64: 4, 128>}, {pipeline_mode = #tpu.pipeline_mode<synchronous>, transform_indices = @transform_5, window_bounds = array<i64: 1, 128>}, {pipeline_mode = #tpu.pipeline_mode<synchronous>, transform_indices = @transform_6, window_bounds = array<i64: 2, 1, 128>}, {pipeline_mode = #tpu.pipeline_mode<synchronous>, transform_indices = @transform_7, window_bounds = array<i64: 2, 128, 640>}, {pipeline_mode = #tpu.pipeline_mode<synchronous>, transform_indices = @transform_8, window_bounds = array<i64: 2, 1, 640>}, {pipeline_mode = #tpu.pipeline_mode<synchronous>, transform_indices = @transform_9, window_bounds = array<i64: 2, 128, 128>}, {pipeline_mode = #tpu.pipeline_mode<synchronous>, transform_indices = @transform_10, window_bounds = array<i64: 2, 1, 128>}, {pipeline_mode = #tpu.pipeline_mode<synchronous>, transform_indices = @transform_11, window_bounds = array<i64: 2, 1, 128>}, {pipeline_mode = #tpu.pipeline_mode<synchronous>, transform_indices = @transform_12, window_bounds = array<i64: 2, 128, 128>}, {pipeline_mode = #tpu.pipeline_mode<synchronous>, transform_indices = @transform_13, window_bounds = array<i64: 2, 1, 128>}, {pipeline_mode = #tpu.pipeline_mode<synchronous>, transform_indices = @transform_14, window_bounds = array<i64: 2, 128, 128>}, {pipeline_mode = #tpu.pipeline_mode<synchronous>, transform_indices = @transform_15, window_bounds = array<i64: 2, 1, 128>}, {pipeline_mode = #tpu.pipeline_mode<synchronous>, transform_indices = @transform_16, window_bounds = array<i64: 1, 128>}, {pipeline_mode = #tpu.pipeline_mode<synchronous>, transform_indices = @transform_17, window_bounds = array<i64: 1, 128>}, {pipeline_mode = #tpu.pipeline_mode<synchronous>, transform_indices = @transform_18, window_bounds = array<i64: 128, 512>}, {transform_indices = @transform_19, window_bounds = array<i64: 8, 512>}]} {
    %c0 = arith.constant 0 : index
    %c0_0 = arith.constant 0 : index
    %0 = vector.load %arg1[%c0, %c0_0] : memref<8x128xf32, #tpu.memory_space<vmem>>, vector<8x128xf32>
    %c0_1 = arith.constant 0 : index
    %c0_2 = arith.constant 0 : index
    %1 = vector.load %arg2[%c0_1, %c0_2] : memref<8x128xf32, #tpu.memory_space<vmem>>, vector<8x128xf32>
    %c0_3 = arith.constant 0 : index
    %c0_4 = arith.constant 0 : index
    %2 = vector.load %arg3[%c0_3, %c0_4] : memref<8x128xf32, #tpu.memory_space<vmem>>, vector<8x128xf32>
    %c0_5 = arith.constant 0 : index
    %c0_6 = arith.constant 0 : index
    %3 = vector.load %arg4[%c0_5, %c0_6] : memref<8x8xf32, #tpu.memory_space<vmem>>, vector<8x8xf32>
    %c0_7 = arith.constant 0 : index
    %c0_8 = arith.constant 0 : index
    %4 = vector.load %arg5[%c0_7, %c0_8] : memref<4x128xf32, #tpu.memory_space<vmem>>, vector<4x128xf32>
    %5 = vector.extract_strided_slice %4 {offsets = [0, 0], sizes = [1, 128], strides = [1, 1]} : vector<4x128xf32> to vector<1x128xf32>
    %6 = vector.extract_strided_slice %4 {offsets = [1, 0], sizes = [1, 128], strides = [1, 1]} : vector<4x128xf32> to vector<1x128xf32>
    %7 = vector.extract_strided_slice %4 {offsets = [2, 0], sizes = [1, 128], strides = [1, 1]} : vector<4x128xf32> to vector<1x128xf32>
    %8 = vector.extract_strided_slice %4 {offsets = [3, 0], sizes = [1, 128], strides = [1, 1]} : vector<4x128xf32> to vector<1x128xf32>
    %9 = arith.mulf %0, %0 : vector<8x128xf32>
    %cst = arith.constant dense<0.000000e+00> : vector<8xf32>
    %10 = vector.multi_reduction <add>, %9, %cst [1] : vector<8x128xf32> to vector<8xf32>
    %11 = vector.shape_cast %10 : vector<8xf32> to vector<8x1xf32>
    %cst_9 = arith.constant 3.125000e-02 : f32
    %12 = vector.broadcast %cst_9 : f32 to vector<8x1xf32>
    %13 = arith.mulf %11, %12 : vector<8x1xf32>
    %cst_10 = arith.constant 1.1920929E-7 : f32
    %14 = vector.broadcast %cst_10 : f32 to vector<8x1xf32>
    %15 = arith.addf %13, %14 : vector<8x1xf32>
    %16 = math.rsqrt %15 : vector<8x1xf32>
    %17 = vector.broadcast %16 : vector<8x1xf32> to vector<8x128xf32>
    %18 = arith.mulf %0, %17 : vector<8x128xf32>
    %c0_11 = arith.constant 0 : index
    %c0_12 = arith.constant 0 : index
    %c0_13 = arith.constant 0 : index
    %19 = vector.load %arg7[%c0_11, %c0_12, %c0_13] : memref<2x1x128xf32, #tpu.memory_space<vmem>>, vector<1x1x128xf32>
    %20 = vector.shape_cast %19 : vector<1x1x128xf32> to vector<1x128xf32>
    %21 = vector.broadcast %20 : vector<1x128xf32> to vector<8x128xf32>
    %22 = arith.mulf %18, %21 : vector<8x128xf32>
    %23 = arith.truncf %22 : vector<8x128xf32> to vector<8x128xbf16>
    %c0_14 = arith.constant 0 : index
    %c0_15 = arith.constant 0 : index
    %c0_16 = arith.constant 0 : index
    %24 = vector.load %arg8[%c0_14, %c0_15, %c0_16] : memref<2x128x640xbf16, #tpu.memory_space<vmem>>, vector<1x128x640xbf16>
    %25 = vector.shape_cast %24 : vector<1x128x640xbf16> to vector<128x640xbf16>
    %cst_17 = arith.constant dense<0.000000e+00> : vector<8x640xf32>
    %26 = tpu.matmul %23, %25, %cst_17 {dimension_numbers = #tpu.dot_dimension_numbers<[1], [0], [0], [1], [0, 0, 1, 1], [], []>} : vector<8x128xbf16>, vector<128x640xbf16>, vector<8x640xf32> -> vector<8x640xf32>
    %c0_18 = arith.constant 0 : index
    %c0_19 = arith.constant 0 : index
    %c0_20 = arith.constant 0 : index
    %27 = vector.load %arg9[%c0_18, %c0_19, %c0_20] : memref<2x1x640xf32, #tpu.memory_space<vmem>>, vector<1x1x640xf32>
    %28 = vector.shape_cast %27 : vector<1x1x640xf32> to vector<1x640xf32>
    %29 = vector.broadcast %28 : vector<1x640xf32> to vector<8x640xf32>
    %30 = arith.addf %26, %29 : vector<8x640xf32>
    %31 = vector.extract_strided_slice %30 {offsets = [0, 0], sizes = [8, 128], strides = [1, 1]} : vector<8x640xf32> to vector<8x128xf32>
    %32 = arith.mulf %31, %1 : vector<8x128xf32>
    %33 = vector.extract_strided_slice %30 {offsets = [0, 384], sizes = [8, 128], strides = [1, 1]} : vector<8x640xf32> to vector<8x128xf32>
    %34 = arith.mulf %33, %2 : vector<8x128xf32>
    %35 = arith.addf %32, %34 : vector<8x128xf32>
    %36 = vector.extract_strided_slice %30 {offsets = [0, 128], sizes = [8, 128], strides = [1, 1]} : vector<8x640xf32> to vector<8x128xf32>
    %37 = arith.mulf %36, %1 : vector<8x128xf32>
    %38 = vector.extract_strided_slice %30 {offsets = [0, 512], sizes = [8, 128], strides = [1, 1]} : vector<8x640xf32> to vector<8x128xf32>
    %39 = arith.mulf %38, %2 : vector<8x128xf32>
    %40 = arith.addf %37, %39 : vector<8x128xf32>
    %41 = vector.extract_strided_slice %30 {offsets = [0, 256], sizes = [8, 128], strides = [1, 1]} : vector<8x640xf32> to vector<8x128xf32>
    %42 = arith.truncf %40 : vector<8x128xf32> to vector<8x128xbf16>
    %43 = arith.truncf %41 : vector<8x128xf32> to vector<8x128xbf16>
    %44 = vector.broadcast %5 : vector<1x128xf32> to vector<8x128xf32>
    %45 = arith.mulf %35, %44 : vector<8x128xf32>
    %46 = arith.truncf %45 : vector<8x128xf32> to vector<8x128xbf16>
    %cst_21 = arith.constant dense<0.000000e+00> : vector<8x8xf32>
    %47 = tpu.matmul %46, %42, %cst_21 {dimension_numbers = #tpu.dot_dimension_numbers<[1], [1], [0], [0], [0, 0, 1, 0], [], []>} : vector<8x128xbf16>, vector<8x128xbf16>, vector<8x8xf32> -> vector<8x8xf32>
    %48 = arith.addf %47, %3 : vector<8x8xf32>
    %cst_22 = arith.constant dense<0xFF800000> : vector<8xf32>
    %49 = vector.multi_reduction <maximumf>, %48, %cst_22 [1] : vector<8x8xf32> to vector<8xf32>
    %50 = vector.shape_cast %49 : vector<8xf32> to vector<8x1xf32>
    %51 = vector.broadcast %50 : vector<8x1xf32> to vector<8x8xf32>
    %52 = arith.subf %48, %51 : vector<8x8xf32>
    %53 = math.exp %52 : vector<8x8xf32>
    %cst_23 = arith.constant dense<0.000000e+00> : vector<8xf32>
    %54 = vector.multi_reduction <add>, %53, %cst_23 [1] : vector<8x8xf32> to vector<8xf32>
    %55 = vector.shape_cast %54 : vector<8xf32> to vector<8x1xf32>
    %56 = vector.broadcast %55 : vector<8x1xf32> to vector<8x8xf32>
    %57 = arith.divf %53, %56 : vector<8x8xf32>
    %58 = arith.truncf %57 : vector<8x8xf32> to vector<8x8xbf16>
    %cst_24 = arith.constant dense<0.000000e+00> : vector<8x128xf32>
    %59 = tpu.matmul %58, %43, %cst_24 {dimension_numbers = #tpu.dot_dimension_numbers<[1], [0], [0], [1], [0, 0, 1, 1], [], []>} : vector<8x8xbf16>, vector<8x128xbf16>, vector<8x128xf32> -> vector<8x128xf32>
    %60 = vector.broadcast %5 : vector<1x128xf32> to vector<8x128xf32>
    %61 = arith.mulf %59, %60 : vector<8x128xf32>
    %62 = vector.broadcast %6 : vector<1x128xf32> to vector<8x128xf32>
    %63 = arith.mulf %35, %62 : vector<8x128xf32>
    %64 = arith.truncf %63 : vector<8x128xf32> to vector<8x128xbf16>
    %cst_25 = arith.constant dense<0.000000e+00> : vector<8x8xf32>
    %65 = tpu.matmul %64, %42, %cst_25 {dimension_numbers = #tpu.dot_dimension_numbers<[1], [1], [0], [0], [0, 0, 1, 0], [], []>} : vector<8x128xbf16>, vector<8x128xbf16>, vector<8x8xf32> -> vector<8x8xf32>
    %66 = arith.addf %65, %3 : vector<8x8xf32>
    %cst_26 = arith.constant dense<0xFF800000> : vector<8xf32>
    %67 = vector.multi_reduction <maximumf>, %66, %cst_26 [1] : vector<8x8xf32> to vector<8xf32>
    %68 = vector.shape_cast %67 : vector<8xf32> to vector<8x1xf32>
    %69 = vector.broadcast %68 : vector<8x1xf32> to vector<8x8xf32>
    %70 = arith.subf %66, %69 : vector<8x8xf32>
    %71 = math.exp %70 : vector<8x8xf32>
    %cst_27 = arith.constant dense<0.000000e+00> : vector<8xf32>
    %72 = vector.multi_reduction <add>, %71, %cst_27 [1] : vector<8x8xf32> to vector<8xf32>
    %73 = vector.shape_cast %72 : vector<8xf32> to vector<8x1xf32>
    %74 = vector.broadcast %73 : vector<8x1xf32> to vector<8x8xf32>
    %75 = arith.divf %71, %74 : vector<8x8xf32>
    %76 = arith.truncf %75 : vector<8x8xf32> to vector<8x8xbf16>
    %cst_28 = arith.constant dense<0.000000e+00> : vector<8x128xf32>
    %77 = tpu.matmul %76, %43, %cst_28 {dimension_numbers = #tpu.dot_dimension_numbers<[1], [0], [0], [1], [0, 0, 1, 1], [], []>} : vector<8x8xbf16>, vector<8x128xbf16>, vector<8x128xf32> -> vector<8x128xf32>
    %78 = vector.broadcast %6 : vector<1x128xf32> to vector<8x128xf32>
    %79 = arith.mulf %77, %78 : vector<8x128xf32>
    %80 = arith.addf %61, %79 : vector<8x128xf32>
    %81 = vector.broadcast %7 : vector<1x128xf32> to vector<8x128xf32>
    %82 = arith.mulf %35, %81 : vector<8x128xf32>
    %83 = arith.truncf %82 : vector<8x128xf32> to vector<8x128xbf16>
    %cst_29 = arith.constant dense<0.000000e+00> : vector<8x8xf32>
    %84 = tpu.matmul %83, %42, %cst_29 {dimension_numbers = #tpu.dot_dimension_numbers<[1], [1], [0], [0], [0, 0, 1, 0], [], []>} : vector<8x128xbf16>, vector<8x128xbf16>, vector<8x8xf32> -> vector<8x8xf32>
    %85 = arith.addf %84, %3 : vector<8x8xf32>
    %cst_30 = arith.constant dense<0xFF800000> : vector<8xf32>
    %86 = vector.multi_reduction <maximumf>, %85, %cst_30 [1] : vector<8x8xf32> to vector<8xf32>
    %87 = vector.shape_cast %86 : vector<8xf32> to vector<8x1xf32>
    %88 = vector.broadcast %87 : vector<8x1xf32> to vector<8x8xf32>
    %89 = arith.subf %85, %88 : vector<8x8xf32>
    %90 = math.exp %89 : vector<8x8xf32>
    %cst_31 = arith.constant dense<0.000000e+00> : vector<8xf32>
    %91 = vector.multi_reduction <add>, %90, %cst_31 [1] : vector<8x8xf32> to vector<8xf32>
    %92 = vector.shape_cast %91 : vector<8xf32> to vector<8x1xf32>
    %93 = vector.broadcast %92 : vector<8x1xf32> to vector<8x8xf32>
    %94 = arith.divf %90, %93 : vector<8x8xf32>
    %95 = arith.truncf %94 : vector<8x8xf32> to vector<8x8xbf16>
    %cst_32 = arith.constant dense<0.000000e+00> : vector<8x128xf32>
    %96 = tpu.matmul %95, %43, %cst_32 {dimension_numbers = #tpu.dot_dimension_numbers<[1], [0], [0], [1], [0, 0, 1, 1], [], []>} : vector<8x8xbf16>, vector<8x128xbf16>, vector<8x128xf32> -> vector<8x128xf32>
    %97 = vector.broadcast %7 : vector<1x128xf32> to vector<8x128xf32>
    %98 = arith.mulf %96, %97 : vector<8x128xf32>
    %99 = arith.addf %80, %98 : vector<8x128xf32>
    %100 = vector.broadcast %8 : vector<1x128xf32> to vector<8x128xf32>
    %101 = arith.mulf %35, %100 : vector<8x128xf32>
    %102 = arith.truncf %101 : vector<8x128xf32> to vector<8x128xbf16>
    %cst_33 = arith.constant dense<0.000000e+00> : vector<8x8xf32>
    %103 = tpu.matmul %102, %42, %cst_33 {dimension_numbers = #tpu.dot_dimension_numbers<[1], [1], [0], [0], [0, 0, 1, 0], [], []>} : vector<8x128xbf16>, vector<8x128xbf16>, vector<8x8xf32> -> vector<8x8xf32>
    %104 = arith.addf %103, %3 : vector<8x8xf32>
    %cst_34 = arith.constant dense<0xFF800000> : vector<8xf32>
    %105 = vector.multi_reduction <maximumf>, %104, %cst_34 [1] : vector<8x8xf32> to vector<8xf32>
    %106 = vector.shape_cast %105 : vector<8xf32> to vector<8x1xf32>
    %107 = vector.broadcast %106 : vector<8x1xf32> to vector<8x8xf32>
    %108 = arith.subf %104, %107 : vector<8x8xf32>
    %109 = math.exp %108 : vector<8x8xf32>
    %cst_35 = arith.constant dense<0.000000e+00> : vector<8xf32>
    %110 = vector.multi_reduction <add>, %109, %cst_35 [1] : vector<8x8xf32> to vector<8xf32>
    %111 = vector.shape_cast %110 : vector<8xf32> to vector<8x1xf32>
    %112 = vector.broadcast %111 : vector<8x1xf32> to vector<8x8xf32>
    %113 = arith.divf %109, %112 : vector<8x8xf32>
    %114 = arith.truncf %113 : vector<8x8xf32> to vector<8x8xbf16>
    %cst_36 = arith.constant dense<0.000000e+00> : vector<8x128xf32>
    %115 = tpu.matmul %114, %43, %cst_36 {dimension_numbers = #tpu.dot_dimension_numbers<[1], [0], [0], [1], [0, 0, 1, 1], [], []>} : vector<8x8xbf16>, vector<8x128xbf16>, vector<8x128xf32> -> vector<8x128xf32>
    %116 = vector.broadcast %8 : vector<1x128xf32> to vector<8x128xf32>
    %117 = arith.mulf %115, %116 : vector<8x128xf32>
    %118 = arith.addf %99, %117 : vector<8x128xf32>
    %119 = arith.truncf %118 : vector<8x128xf32> to vector<8x128xbf16>
    %c0_37 = arith.constant 0 : index
    %c0_38 = arith.constant 0 : index
    %c0_39 = arith.constant 0 : index
    %120 = vector.load %arg10[%c0_37, %c0_38, %c0_39] : memref<2x128x128xbf16, #tpu.memory_space<vmem>>, vector<1x128x128xbf16>
    %121 = vector.shape_cast %120 : vector<1x128x128xbf16> to vector<128x128xbf16>
    %cst_40 = arith.constant dense<0.000000e+00> : vector<8x128xf32>
    %122 = tpu.matmul %119, %121, %cst_40 {dimension_numbers = #tpu.dot_dimension_numbers<[1], [0], [0], [1], [0, 0, 1, 1], [], []>} : vector<8x128xbf16>, vector<128x128xbf16>, vector<8x128xf32> -> vector<8x128xf32>
    %c0_41 = arith.constant 0 : index
    %c0_42 = arith.constant 0 : index
    %c0_43 = arith.constant 0 : index
    %123 = vector.load %arg11[%c0_41, %c0_42, %c0_43] : memref<2x1x128xf32, #tpu.memory_space<vmem>>, vector<1x1x128xf32>
    %124 = vector.shape_cast %123 : vector<1x1x128xf32> to vector<1x128xf32>
    %125 = vector.broadcast %124 : vector<1x128xf32> to vector<8x128xf32>
    %126 = arith.addf %122, %125 : vector<8x128xf32>
    %127 = arith.addf %0, %126 : vector<8x128xf32>
    %128 = arith.mulf %127, %127 : vector<8x128xf32>
    %cst_44 = arith.constant dense<0.000000e+00> : vector<8xf32>
    %129 = vector.multi_reduction <add>, %128, %cst_44 [1] : vector<8x128xf32> to vector<8xf32>
    %130 = vector.shape_cast %129 : vector<8xf32> to vector<8x1xf32>
    %cst_45 = arith.constant 3.125000e-02 : f32
    %131 = vector.broadcast %cst_45 : f32 to vector<8x1xf32>
    %132 = arith.mulf %130, %131 : vector<8x1xf32>
    %cst_46 = arith.constant 1.1920929E-7 : f32
    %133 = vector.broadcast %cst_46 : f32 to vector<8x1xf32>
    %134 = arith.addf %132, %133 : vector<8x1xf32>
    %135 = math.rsqrt %134 : vector<8x1xf32>
    %136 = vector.broadcast %135 : vector<8x1xf32> to vector<8x128xf32>
    %137 = arith.mulf %127, %136 : vector<8x128xf32>
    %c0_47 = arith.constant 0 : index
    %c0_48 = arith.constant 0 : index
    %c0_49 = arith.constant 0 : index
    %138 = vector.load %arg12[%c0_47, %c0_48, %c0_49] : memref<2x1x128xf32, #tpu.memory_space<vmem>>, vector<1x1x128xf32>
    %139 = vector.shape_cast %138 : vector<1x1x128xf32> to vector<1x128xf32>
    %140 = vector.broadcast %139 : vector<1x128xf32> to vector<8x128xf32>
    %141 = arith.mulf %137, %140 : vector<8x128xf32>
    %142 = arith.truncf %141 : vector<8x128xf32> to vector<8x128xbf16>
    %c0_50 = arith.constant 0 : index
    %c0_51 = arith.constant 0 : index
    %c0_52 = arith.constant 0 : index
    %143 = vector.load %arg13[%c0_50, %c0_51, %c0_52] : memref<2x128x128xbf16, #tpu.memory_space<vmem>>, vector<1x128x128xbf16>
    %144 = vector.shape_cast %143 : vector<1x128x128xbf16> to vector<128x128xbf16>
    %cst_53 = arith.constant dense<0.000000e+00> : vector<8x128xf32>
    %145 = tpu.matmul %142, %144, %cst_53 {dimension_numbers = #tpu.dot_dimension_numbers<[1], [0], [0], [1], [0, 0, 1, 1], [], []>} : vector<8x128xbf16>, vector<128x128xbf16>, vector<8x128xf32> -> vector<8x128xf32>
    %c0_54 = arith.constant 0 : index
    %c0_55 = arith.constant 0 : index
    %c0_56 = arith.constant 0 : index
    %146 = vector.load %arg14[%c0_54, %c0_55, %c0_56] : memref<2x1x128xf32, #tpu.memory_space<vmem>>, vector<1x1x128xf32>
    %147 = vector.shape_cast %146 : vector<1x1x128xf32> to vector<1x128xf32>
    %148 = vector.broadcast %147 : vector<1x128xf32> to vector<8x128xf32>
    %149 = arith.addf %145, %148 : vector<8x128xf32>
    %150 = arith.negf %149 : vector<8x128xf32>
    %151 = math.exp %150 : vector<8x128xf32>
    %cst_57 = arith.constant 1.000000e+00 : f32
    %152 = vector.broadcast %cst_57 : f32 to vector<8x128xf32>
    %153 = arith.addf %152, %151 : vector<8x128xf32>
    %154 = arith.divf %152, %153 : vector<8x128xf32>
    %155 = arith.mulf %149, %154 : vector<8x128xf32>
    %156 = arith.truncf %155 : vector<8x128xf32> to vector<8x128xbf16>
    %c0_58 = arith.constant 0 : index
    %c0_59 = arith.constant 0 : index
    %c0_60 = arith.constant 0 : index
    %157 = vector.load %arg15[%c0_58, %c0_59, %c0_60] : memref<2x128x128xbf16, #tpu.memory_space<vmem>>, vector<1x128x128xbf16>
    %158 = vector.shape_cast %157 : vector<1x128x128xbf16> to vector<128x128xbf16>
    %cst_61 = arith.constant dense<0.000000e+00> : vector<8x128xf32>
    %159 = tpu.matmul %156, %158, %cst_61 {dimension_numbers = #tpu.dot_dimension_numbers<[1], [0], [0], [1], [0, 0, 1, 1], [], []>} : vector<8x128xbf16>, vector<128x128xbf16>, vector<8x128xf32> -> vector<8x128xf32>
    %160 = arith.addf %127, %159 : vector<8x128xf32>
    %c0_62 = arith.constant 0 : index
    %c0_63 = arith.constant 0 : index
    %c0_64 = arith.constant 0 : index
    %161 = vector.load %arg16[%c0_62, %c0_63, %c0_64] : memref<2x1x128xf32, #tpu.memory_space<vmem>>, vector<1x1x128xf32>
    %162 = vector.shape_cast %161 : vector<1x1x128xf32> to vector<1x128xf32>
    %163 = vector.broadcast %162 : vector<1x128xf32> to vector<8x128xf32>
    %164 = arith.addf %160, %163 : vector<8x128xf32>
    %165 = arith.mulf %164, %164 : vector<8x128xf32>
    %cst_65 = arith.constant dense<0.000000e+00> : vector<8xf32>
    %166 = vector.multi_reduction <add>, %165, %cst_65 [1] : vector<8x128xf32> to vector<8xf32>
    %167 = vector.shape_cast %166 : vector<8xf32> to vector<8x1xf32>
    %cst_66 = arith.constant 3.125000e-02 : f32
    %168 = vector.broadcast %cst_66 : f32 to vector<8x1xf32>
    %169 = arith.mulf %167, %168 : vector<8x1xf32>
    %cst_67 = arith.constant 1.1920929E-7 : f32
    %170 = vector.broadcast %cst_67 : f32 to vector<8x1xf32>
    %171 = arith.addf %169, %170 : vector<8x1xf32>
    %172 = math.rsqrt %171 : vector<8x1xf32>
    %173 = vector.broadcast %172 : vector<8x1xf32> to vector<8x128xf32>
    %174 = arith.mulf %164, %173 : vector<8x128xf32>
    %c1 = arith.constant 1 : index
    %c0_68 = arith.constant 0 : index
    %c0_69 = arith.constant 0 : index
    %175 = vector.load %arg7[%c1, %c0_68, %c0_69] : memref<2x1x128xf32, #tpu.memory_space<vmem>>, vector<1x1x128xf32>
    %176 = vector.shape_cast %175 : vector<1x1x128xf32> to vector<1x128xf32>
    %177 = vector.broadcast %176 : vector<1x128xf32> to vector<8x128xf32>
    %178 = arith.mulf %174, %177 : vector<8x128xf32>
    %179 = arith.truncf %178 : vector<8x128xf32> to vector<8x128xbf16>
    %c1_70 = arith.constant 1 : index
    %c0_71 = arith.constant 0 : index
    %c0_72 = arith.constant 0 : index
    %180 = vector.load %arg8[%c1_70, %c0_71, %c0_72] : memref<2x128x640xbf16, #tpu.memory_space<vmem>>, vector<1x128x640xbf16>
    %181 = vector.shape_cast %180 : vector<1x128x640xbf16> to vector<128x640xbf16>
    %cst_73 = arith.constant dense<0.000000e+00> : vector<8x640xf32>
    %182 = tpu.matmul %179, %181, %cst_73 {dimension_numbers = #tpu.dot_dimension_numbers<[1], [0], [0], [1], [0, 0, 1, 1], [], []>} : vector<8x128xbf16>, vector<128x640xbf16>, vector<8x640xf32> -> vector<8x640xf32>
    %c1_74 = arith.constant 1 : index
    %c0_75 = arith.constant 0 : index
    %c0_76 = arith.constant 0 : index
    %183 = vector.load %arg9[%c1_74, %c0_75, %c0_76] : memref<2x1x640xf32, #tpu.memory_space<vmem>>, vector<1x1x640xf32>
    %184 = vector.shape_cast %183 : vector<1x1x640xf32> to vector<1x640xf32>
    %185 = vector.broadcast %184 : vector<1x640xf32> to vector<8x640xf32>
    %186 = arith.addf %182, %185 : vector<8x640xf32>
    %187 = vector.extract_strided_slice %186 {offsets = [0, 0], sizes = [8, 128], strides = [1, 1]} : vector<8x640xf32> to vector<8x128xf32>
    %188 = arith.mulf %187, %1 : vector<8x128xf32>
    %189 = vector.extract_strided_slice %186 {offsets = [0, 384], sizes = [8, 128], strides = [1, 1]} : vector<8x640xf32> to vector<8x128xf32>
    %190 = arith.mulf %189, %2 : vector<8x128xf32>
    %191 = arith.addf %188, %190 : vector<8x128xf32>
    %192 = vector.extract_strided_slice %186 {offsets = [0, 128], sizes = [8, 128], strides = [1, 1]} : vector<8x640xf32> to vector<8x128xf32>
    %193 = arith.mulf %192, %1 : vector<8x128xf32>
    %194 = vector.extract_strided_slice %186 {offsets = [0, 512], sizes = [8, 128], strides = [1, 1]} : vector<8x640xf32> to vector<8x128xf32>
    %195 = arith.mulf %194, %2 : vector<8x128xf32>
    %196 = arith.addf %193, %195 : vector<8x128xf32>
    %197 = vector.extract_strided_slice %186 {offsets = [0, 256], sizes = [8, 128], strides = [1, 1]} : vector<8x640xf32> to vector<8x128xf32>
    %198 = arith.truncf %196 : vector<8x128xf32> to vector<8x128xbf16>
    %199 = arith.truncf %197 : vector<8x128xf32> to vector<8x128xbf16>
    %200 = vector.broadcast %5 : vector<1x128xf32> to vector<8x128xf32>
    %201 = arith.mulf %191, %200 : vector<8x128xf32>
    %202 = arith.truncf %201 : vector<8x128xf32> to vector<8x128xbf16>
    %cst_77 = arith.constant dense<0.000000e+00> : vector<8x8xf32>
    %203 = tpu.matmul %202, %198, %cst_77 {dimension_numbers = #tpu.dot_dimension_numbers<[1], [1], [0], [0], [0, 0, 1, 0], [], []>} : vector<8x128xbf16>, vector<8x128xbf16>, vector<8x8xf32> -> vector<8x8xf32>
    %204 = arith.addf %203, %3 : vector<8x8xf32>
    %cst_78 = arith.constant dense<0xFF800000> : vector<8xf32>
    %205 = vector.multi_reduction <maximumf>, %204, %cst_78 [1] : vector<8x8xf32> to vector<8xf32>
    %206 = vector.shape_cast %205 : vector<8xf32> to vector<8x1xf32>
    %207 = vector.broadcast %206 : vector<8x1xf32> to vector<8x8xf32>
    %208 = arith.subf %204, %207 : vector<8x8xf32>
    %209 = math.exp %208 : vector<8x8xf32>
    %cst_79 = arith.constant dense<0.000000e+00> : vector<8xf32>
    %210 = vector.multi_reduction <add>, %209, %cst_79 [1] : vector<8x8xf32> to vector<8xf32>
    %211 = vector.shape_cast %210 : vector<8xf32> to vector<8x1xf32>
    %212 = vector.broadcast %211 : vector<8x1xf32> to vector<8x8xf32>
    %213 = arith.divf %209, %212 : vector<8x8xf32>
    %214 = arith.truncf %213 : vector<8x8xf32> to vector<8x8xbf16>
    %cst_80 = arith.constant dense<0.000000e+00> : vector<8x128xf32>
    %215 = tpu.matmul %214, %199, %cst_80 {dimension_numbers = #tpu.dot_dimension_numbers<[1], [0], [0], [1], [0, 0, 1, 1], [], []>} : vector<8x8xbf16>, vector<8x128xbf16>, vector<8x128xf32> -> vector<8x128xf32>
    %216 = vector.broadcast %5 : vector<1x128xf32> to vector<8x128xf32>
    %217 = arith.mulf %215, %216 : vector<8x128xf32>
    %218 = vector.broadcast %6 : vector<1x128xf32> to vector<8x128xf32>
    %219 = arith.mulf %191, %218 : vector<8x128xf32>
    %220 = arith.truncf %219 : vector<8x128xf32> to vector<8x128xbf16>
    %cst_81 = arith.constant dense<0.000000e+00> : vector<8x8xf32>
    %221 = tpu.matmul %220, %198, %cst_81 {dimension_numbers = #tpu.dot_dimension_numbers<[1], [1], [0], [0], [0, 0, 1, 0], [], []>} : vector<8x128xbf16>, vector<8x128xbf16>, vector<8x8xf32> -> vector<8x8xf32>
    %222 = arith.addf %221, %3 : vector<8x8xf32>
    %cst_82 = arith.constant dense<0xFF800000> : vector<8xf32>
    %223 = vector.multi_reduction <maximumf>, %222, %cst_82 [1] : vector<8x8xf32> to vector<8xf32>
    %224 = vector.shape_cast %223 : vector<8xf32> to vector<8x1xf32>
    %225 = vector.broadcast %224 : vector<8x1xf32> to vector<8x8xf32>
    %226 = arith.subf %222, %225 : vector<8x8xf32>
    %227 = math.exp %226 : vector<8x8xf32>
    %cst_83 = arith.constant dense<0.000000e+00> : vector<8xf32>
    %228 = vector.multi_reduction <add>, %227, %cst_83 [1] : vector<8x8xf32> to vector<8xf32>
    %229 = vector.shape_cast %228 : vector<8xf32> to vector<8x1xf32>
    %230 = vector.broadcast %229 : vector<8x1xf32> to vector<8x8xf32>
    %231 = arith.divf %227, %230 : vector<8x8xf32>
    %232 = arith.truncf %231 : vector<8x8xf32> to vector<8x8xbf16>
    %cst_84 = arith.constant dense<0.000000e+00> : vector<8x128xf32>
    %233 = tpu.matmul %232, %199, %cst_84 {dimension_numbers = #tpu.dot_dimension_numbers<[1], [0], [0], [1], [0, 0, 1, 1], [], []>} : vector<8x8xbf16>, vector<8x128xbf16>, vector<8x128xf32> -> vector<8x128xf32>
    %234 = vector.broadcast %6 : vector<1x128xf32> to vector<8x128xf32>
    %235 = arith.mulf %233, %234 : vector<8x128xf32>
    %236 = arith.addf %217, %235 : vector<8x128xf32>
    %237 = vector.broadcast %7 : vector<1x128xf32> to vector<8x128xf32>
    %238 = arith.mulf %191, %237 : vector<8x128xf32>
    %239 = arith.truncf %238 : vector<8x128xf32> to vector<8x128xbf16>
    %cst_85 = arith.constant dense<0.000000e+00> : vector<8x8xf32>
    %240 = tpu.matmul %239, %198, %cst_85 {dimension_numbers = #tpu.dot_dimension_numbers<[1], [1], [0], [0], [0, 0, 1, 0], [], []>} : vector<8x128xbf16>, vector<8x128xbf16>, vector<8x8xf32> -> vector<8x8xf32>
    %241 = arith.addf %240, %3 : vector<8x8xf32>
    %cst_86 = arith.constant dense<0xFF800000> : vector<8xf32>
    %242 = vector.multi_reduction <maximumf>, %241, %cst_86 [1] : vector<8x8xf32> to vector<8xf32>
    %243 = vector.shape_cast %242 : vector<8xf32> to vector<8x1xf32>
    %244 = vector.broadcast %243 : vector<8x1xf32> to vector<8x8xf32>
    %245 = arith.subf %241, %244 : vector<8x8xf32>
    %246 = math.exp %245 : vector<8x8xf32>
    %cst_87 = arith.constant dense<0.000000e+00> : vector<8xf32>
    %247 = vector.multi_reduction <add>, %246, %cst_87 [1] : vector<8x8xf32> to vector<8xf32>
    %248 = vector.shape_cast %247 : vector<8xf32> to vector<8x1xf32>
    %249 = vector.broadcast %248 : vector<8x1xf32> to vector<8x8xf32>
    %250 = arith.divf %246, %249 : vector<8x8xf32>
    %251 = arith.truncf %250 : vector<8x8xf32> to vector<8x8xbf16>
    %cst_88 = arith.constant dense<0.000000e+00> : vector<8x128xf32>
    %252 = tpu.matmul %251, %199, %cst_88 {dimension_numbers = #tpu.dot_dimension_numbers<[1], [0], [0], [1], [0, 0, 1, 1], [], []>} : vector<8x8xbf16>, vector<8x128xbf16>, vector<8x128xf32> -> vector<8x128xf32>
    %253 = vector.broadcast %7 : vector<1x128xf32> to vector<8x128xf32>
    %254 = arith.mulf %252, %253 : vector<8x128xf32>
    %255 = arith.addf %236, %254 : vector<8x128xf32>
    %256 = vector.broadcast %8 : vector<1x128xf32> to vector<8x128xf32>
    %257 = arith.mulf %191, %256 : vector<8x128xf32>
    %258 = arith.truncf %257 : vector<8x128xf32> to vector<8x128xbf16>
    %cst_89 = arith.constant dense<0.000000e+00> : vector<8x8xf32>
    %259 = tpu.matmul %258, %198, %cst_89 {dimension_numbers = #tpu.dot_dimension_numbers<[1], [1], [0], [0], [0, 0, 1, 0], [], []>} : vector<8x128xbf16>, vector<8x128xbf16>, vector<8x8xf32> -> vector<8x8xf32>
    %260 = arith.addf %259, %3 : vector<8x8xf32>
    %cst_90 = arith.constant dense<0xFF800000> : vector<8xf32>
    %261 = vector.multi_reduction <maximumf>, %260, %cst_90 [1] : vector<8x8xf32> to vector<8xf32>
    %262 = vector.shape_cast %261 : vector<8xf32> to vector<8x1xf32>
    %263 = vector.broadcast %262 : vector<8x1xf32> to vector<8x8xf32>
    %264 = arith.subf %260, %263 : vector<8x8xf32>
    %265 = math.exp %264 : vector<8x8xf32>
    %cst_91 = arith.constant dense<0.000000e+00> : vector<8xf32>
    %266 = vector.multi_reduction <add>, %265, %cst_91 [1] : vector<8x8xf32> to vector<8xf32>
    %267 = vector.shape_cast %266 : vector<8xf32> to vector<8x1xf32>
    %268 = vector.broadcast %267 : vector<8x1xf32> to vector<8x8xf32>
    %269 = arith.divf %265, %268 : vector<8x8xf32>
    %270 = arith.truncf %269 : vector<8x8xf32> to vector<8x8xbf16>
    %cst_92 = arith.constant dense<0.000000e+00> : vector<8x128xf32>
    %271 = tpu.matmul %270, %199, %cst_92 {dimension_numbers = #tpu.dot_dimension_numbers<[1], [0], [0], [1], [0, 0, 1, 1], [], []>} : vector<8x8xbf16>, vector<8x128xbf16>, vector<8x128xf32> -> vector<8x128xf32>
    %272 = vector.broadcast %8 : vector<1x128xf32> to vector<8x128xf32>
    %273 = arith.mulf %271, %272 : vector<8x128xf32>
    %274 = arith.addf %255, %273 : vector<8x128xf32>
    %275 = arith.truncf %274 : vector<8x128xf32> to vector<8x128xbf16>
    %c1_93 = arith.constant 1 : index
    %c0_94 = arith.constant 0 : index
    %c0_95 = arith.constant 0 : index
    %276 = vector.load %arg10[%c1_93, %c0_94, %c0_95] : memref<2x128x128xbf16, #tpu.memory_space<vmem>>, vector<1x128x128xbf16>
    %277 = vector.shape_cast %276 : vector<1x128x128xbf16> to vector<128x128xbf16>
    %cst_96 = arith.constant dense<0.000000e+00> : vector<8x128xf32>
    %278 = tpu.matmul %275, %277, %cst_96 {dimension_numbers = #tpu.dot_dimension_numbers<[1], [0], [0], [1], [0, 0, 1, 1], [], []>} : vector<8x128xbf16>, vector<128x128xbf16>, vector<8x128xf32> -> vector<8x128xf32>
    %c1_97 = arith.constant 1 : index
    %c0_98 = arith.constant 0 : index
    %c0_99 = arith.constant 0 : index
    %279 = vector.load %arg11[%c1_97, %c0_98, %c0_99] : memref<2x1x128xf32, #tpu.memory_space<vmem>>, vector<1x1x128xf32>
    %280 = vector.shape_cast %279 : vector<1x1x128xf32> to vector<1x128xf32>
    %281 = vector.broadcast %280 : vector<1x128xf32> to vector<8x128xf32>
    %282 = arith.addf %278, %281 : vector<8x128xf32>
    %283 = arith.addf %164, %282 : vector<8x128xf32>
    %284 = arith.mulf %283, %283 : vector<8x128xf32>
    %cst_100 = arith.constant dense<0.000000e+00> : vector<8xf32>
    %285 = vector.multi_reduction <add>, %284, %cst_100 [1] : vector<8x128xf32> to vector<8xf32>
    %286 = vector.shape_cast %285 : vector<8xf32> to vector<8x1xf32>
    %cst_101 = arith.constant 3.125000e-02 : f32
    %287 = vector.broadcast %cst_101 : f32 to vector<8x1xf32>
    %288 = arith.mulf %286, %287 : vector<8x1xf32>
    %cst_102 = arith.constant 1.1920929E-7 : f32
    %289 = vector.broadcast %cst_102 : f32 to vector<8x1xf32>
    %290 = arith.addf %288, %289 : vector<8x1xf32>
    %291 = math.rsqrt %290 : vector<8x1xf32>
    %292 = vector.broadcast %291 : vector<8x1xf32> to vector<8x128xf32>
    %293 = arith.mulf %283, %292 : vector<8x128xf32>
    %c1_103 = arith.constant 1 : index
    %c0_104 = arith.constant 0 : index
    %c0_105 = arith.constant 0 : index
    %294 = vector.load %arg12[%c1_103, %c0_104, %c0_105] : memref<2x1x128xf32, #tpu.memory_space<vmem>>, vector<1x1x128xf32>
    %295 = vector.shape_cast %294 : vector<1x1x128xf32> to vector<1x128xf32>
    %296 = vector.broadcast %295 : vector<1x128xf32> to vector<8x128xf32>
    %297 = arith.mulf %293, %296 : vector<8x128xf32>
    %298 = arith.truncf %297 : vector<8x128xf32> to vector<8x128xbf16>
    %c1_106 = arith.constant 1 : index
    %c0_107 = arith.constant 0 : index
    %c0_108 = arith.constant 0 : index
    %299 = vector.load %arg13[%c1_106, %c0_107, %c0_108] : memref<2x128x128xbf16, #tpu.memory_space<vmem>>, vector<1x128x128xbf16>
    %300 = vector.shape_cast %299 : vector<1x128x128xbf16> to vector<128x128xbf16>
    %cst_109 = arith.constant dense<0.000000e+00> : vector<8x128xf32>
    %301 = tpu.matmul %298, %300, %cst_109 {dimension_numbers = #tpu.dot_dimension_numbers<[1], [0], [0], [1], [0, 0, 1, 1], [], []>} : vector<8x128xbf16>, vector<128x128xbf16>, vector<8x128xf32> -> vector<8x128xf32>
    %c1_110 = arith.constant 1 : index
    %c0_111 = arith.constant 0 : index
    %c0_112 = arith.constant 0 : index
    %302 = vector.load %arg14[%c1_110, %c0_111, %c0_112] : memref<2x1x128xf32, #tpu.memory_space<vmem>>, vector<1x1x128xf32>
    %303 = vector.shape_cast %302 : vector<1x1x128xf32> to vector<1x128xf32>
    %304 = vector.broadcast %303 : vector<1x128xf32> to vector<8x128xf32>
    %305 = arith.addf %301, %304 : vector<8x128xf32>
    %306 = arith.negf %305 : vector<8x128xf32>
    %307 = math.exp %306 : vector<8x128xf32>
    %cst_113 = arith.constant 1.000000e+00 : f32
    %308 = vector.broadcast %cst_113 : f32 to vector<8x128xf32>
    %309 = arith.addf %308, %307 : vector<8x128xf32>
    %310 = arith.divf %308, %309 : vector<8x128xf32>
    %311 = arith.mulf %305, %310 : vector<8x128xf32>
    %312 = arith.truncf %311 : vector<8x128xf32> to vector<8x128xbf16>
    %c1_114 = arith.constant 1 : index
    %c0_115 = arith.constant 0 : index
    %c0_116 = arith.constant 0 : index
    %313 = vector.load %arg15[%c1_114, %c0_115, %c0_116] : memref<2x128x128xbf16, #tpu.memory_space<vmem>>, vector<1x128x128xbf16>
    %314 = vector.shape_cast %313 : vector<1x128x128xbf16> to vector<128x128xbf16>
    %cst_117 = arith.constant dense<0.000000e+00> : vector<8x128xf32>
    %315 = tpu.matmul %312, %314, %cst_117 {dimension_numbers = #tpu.dot_dimension_numbers<[1], [0], [0], [1], [0, 0, 1, 1], [], []>} : vector<8x128xbf16>, vector<128x128xbf16>, vector<8x128xf32> -> vector<8x128xf32>
    %316 = arith.addf %283, %315 : vector<8x128xf32>
    %c1_118 = arith.constant 1 : index
    %c0_119 = arith.constant 0 : index
    %c0_120 = arith.constant 0 : index
    %317 = vector.load %arg16[%c1_118, %c0_119, %c0_120] : memref<2x1x128xf32, #tpu.memory_space<vmem>>, vector<1x1x128xf32>
    %318 = vector.shape_cast %317 : vector<1x1x128xf32> to vector<1x128xf32>
    %319 = vector.broadcast %318 : vector<1x128xf32> to vector<8x128xf32>
    %320 = arith.addf %316, %319 : vector<8x128xf32>
    %c0_121 = arith.constant 0 : index
    %c0_122 = arith.constant 0 : index
    %321 = vector.load %arg6[%c0_121, %c0_122] : memref<1x128xf32, #tpu.memory_space<vmem>>, vector<1x128xf32>
    %cst_123 = arith.constant dense<0.000000e+00> : vector<8xf32>
    %322 = vector.multi_reduction <add>, %320, %cst_123 [1] : vector<8x128xf32> to vector<8xf32>
    %323 = vector.shape_cast %322 : vector<8xf32> to vector<8x1xf32>
    %cst_124 = arith.constant 3.125000e-02 : f32
    %324 = vector.broadcast %cst_124 : f32 to vector<8x1xf32>
    %325 = arith.mulf %323, %324 : vector<8x1xf32>
    %326 = vector.broadcast %325 : vector<8x1xf32> to vector<8x128xf32>
    %327 = arith.subf %320, %326 : vector<8x128xf32>
    %328 = vector.broadcast %321 : vector<1x128xf32> to vector<8x128xf32>
    %329 = arith.mulf %327, %328 : vector<8x128xf32>
    %330 = arith.mulf %329, %329 : vector<8x128xf32>
    %cst_125 = arith.constant dense<0.000000e+00> : vector<8xf32>
    %331 = vector.multi_reduction <add>, %330, %cst_125 [1] : vector<8x128xf32> to vector<8xf32>
    %332 = vector.shape_cast %331 : vector<8xf32> to vector<8x1xf32>
    %cst_126 = arith.constant 3.125000e-02 : f32
    %333 = vector.broadcast %cst_126 : f32 to vector<8x1xf32>
    %334 = arith.mulf %332, %333 : vector<8x1xf32>
    %cst_127 = arith.constant 9.99999974E-6 : f32
    %335 = vector.broadcast %cst_127 : f32 to vector<8x1xf32>
    %336 = arith.addf %334, %335 : vector<8x1xf32>
    %337 = math.rsqrt %336 : vector<8x1xf32>
    %338 = vector.broadcast %337 : vector<8x1xf32> to vector<8x128xf32>
    %339 = arith.mulf %329, %338 : vector<8x128xf32>
    %c0_128 = arith.constant 0 : index
    %c0_129 = arith.constant 0 : index
    %340 = vector.load %arg17[%c0_128, %c0_129] : memref<1x128xf32, #tpu.memory_space<vmem>>, vector<1x128xf32>
    %341 = vector.broadcast %340 : vector<1x128xf32> to vector<8x128xf32>
    %342 = arith.mulf %339, %341 : vector<8x128xf32>
    %c0_130 = arith.constant 0 : index
    %c0_131 = arith.constant 0 : index
    %343 = vector.load %arg18[%c0_130, %c0_131] : memref<1x128xf32, #tpu.memory_space<vmem>>, vector<1x128xf32>
    %344 = vector.broadcast %343 : vector<1x128xf32> to vector<8x128xf32>
    %345 = arith.addf %342, %344 : vector<8x128xf32>
    %346 = arith.truncf %345 : vector<8x128xf32> to vector<8x128xbf16>
    %c0_132 = arith.constant 0 : index
    %c0_133 = arith.constant 0 : index
    %347 = vector.load %arg19[%c0_132, %c0_133] : memref<128x512xbf16, #tpu.memory_space<vmem>>, vector<128x512xbf16>
    %cst_134 = arith.constant dense<0.000000e+00> : vector<8x512xf32>
    %348 = tpu.matmul %346, %347, %cst_134 {dimension_numbers = #tpu.dot_dimension_numbers<[1], [0], [0], [1], [0, 0, 1, 1], [], []>} : vector<8x128xbf16>, vector<128x512xbf16>, vector<8x512xf32> -> vector<8x512xf32>
    %c0_135 = arith.constant 0 : index
    %c0_136 = arith.constant 0 : index
    %349 = vector.load %arg20[%c0_135, %c0_136] : memref<8x512xf32, #tpu.memory_space<vmem>>, vector<8x512xf32>
    tpu.vector_store %arg20[%c0_135, %c0_136], %348 {strides = array<i32>} : memref<8x512xf32, #tpu.memory_space<vmem>>, vector<8x512xf32>,
    return
  }
  func.func @transform_0(%arg0: i32) -> (i32, i32) {
    %c0_i32 = arith.constant 0 : i32
    %c0_i32_0 = arith.constant 0 : i32
    return %arg0, %c0_i32 : i32, i32
  }
  func.func @transform_1(%arg0: i32) -> (i32, i32) {
    %c0_i32 = arith.constant 0 : i32
    %c0_i32_0 = arith.constant 0 : i32
    %c0_i32_1 = arith.constant 0 : i32
    return %c0_i32, %c0_i32_0 : i32, i32
  }
  func.func @transform_2(%arg0: i32) -> (i32, i32) {
    %c0_i32 = arith.constant 0 : i32
    %c0_i32_0 = arith.constant 0 : i32
    %c0_i32_1 = arith.constant 0 : i32
    return %c0_i32, %c0_i32_0 : i32, i32
  }
  func.func @transform_3(%arg0: i32) -> (i32, i32) {
    %c0_i32 = arith.constant 0 : i32
    %c0_i32_0 = arith.constant 0 : i32
    %c0_i32_1 = arith.constant 0 : i32
    return %c0_i32, %c0_i32_0 : i32, i32
  }
  func.func @transform_4(%arg0: i32) -> (i32, i32) {
    %c0_i32 = arith.constant 0 : i32
    %c0_i32_0 = arith.constant 0 : i32
    %c0_i32_1 = arith.constant 0 : i32
    return %c0_i32, %c0_i32_0 : i32, i32
  }
  func.func @transform_5(%arg0: i32) -> (i32, i32) {
    %c0_i32 = arith.constant 0 : i32
    %c0_i32_0 = arith.constant 0 : i32
    %c0_i32_1 = arith.constant 0 : i32
    return %c0_i32, %c0_i32_0 : i32, i32
  }
  func.func @transform_6(%arg0: i32) -> (i32, i32, i32) {
    %c0_i32 = arith.constant 0 : i32
    %c0_i32_0 = arith.constant 0 : i32
    %c0_i32_1 = arith.constant 0 : i32
    %c0_i32_2 = arith.constant 0 : i32
    return %c0_i32, %c0_i32_0, %c0_i32_1 : i32, i32, i32
  }
  func.func @transform_7(%arg0: i32) -> (i32, i32, i32) {
    %c0_i32 = arith.constant 0 : i32
    %c0_i32_0 = arith.constant 0 : i32
    %c0_i32_1 = arith.constant 0 : i32
    %c0_i32_2 = arith.constant 0 : i32
    return %c0_i32, %c0_i32_0, %c0_i32_1 : i32, i32, i32
  }
  func.func @transform_8(%arg0: i32) -> (i32, i32, i32) {
    %c0_i32 = arith.constant 0 : i32
    %c0_i32_0 = arith.constant 0 : i32
    %c0_i32_1 = arith.constant 0 : i32
    %c0_i32_2 = arith.constant 0 : i32
    return %c0_i32, %c0_i32_0, %c0_i32_1 : i32, i32, i32
  }
  func.func @transform_9(%arg0: i32) -> (i32, i32, i32) {
    %c0_i32 = arith.constant 0 : i32
    %c0_i32_0 = arith.constant 0 : i32
    %c0_i32_1 = arith.constant 0 : i32
    %c0_i32_2 = arith.constant 0 : i32
    return %c0_i32, %c0_i32_0, %c0_i32_1 : i32, i32, i32
  }
  func.func @transform_10(%arg0: i32) -> (i32, i32, i32) {
    %c0_i32 = arith.constant 0 : i32
    %c0_i32_0 = arith.constant 0 : i32
    %c0_i32_1 = arith.constant 0 : i32
    %c0_i32_2 = arith.constant 0 : i32
    return %c0_i32, %c0_i32_0, %c0_i32_1 : i32, i32, i32
  }
  func.func @transform_11(%arg0: i32) -> (i32, i32, i32) {
    %c0_i32 = arith.constant 0 : i32
    %c0_i32_0 = arith.constant 0 : i32
    %c0_i32_1 = arith.constant 0 : i32
    %c0_i32_2 = arith.constant 0 : i32
    return %c0_i32, %c0_i32_0, %c0_i32_1 : i32, i32, i32
  }
  func.func @transform_12(%arg0: i32) -> (i32, i32, i32) {
    %c0_i32 = arith.constant 0 : i32
    %c0_i32_0 = arith.constant 0 : i32
    %c0_i32_1 = arith.constant 0 : i32
    %c0_i32_2 = arith.constant 0 : i32
    return %c0_i32, %c0_i32_0, %c0_i32_1 : i32, i32, i32
  }
  func.func @transform_13(%arg0: i32) -> (i32, i32, i32) {
    %c0_i32 = arith.constant 0 : i32
    %c0_i32_0 = arith.constant 0 : i32
    %c0_i32_1 = arith.constant 0 : i32
    %c0_i32_2 = arith.constant 0 : i32
    return %c0_i32, %c0_i32_0, %c0_i32_1 : i32, i32, i32
  }
  func.func @transform_14(%arg0: i32) -> (i32, i32, i32) {
    %c0_i32 = arith.constant 0 : i32
    %c0_i32_0 = arith.constant 0 : i32
    %c0_i32_1 = arith.constant 0 : i32
    %c0_i32_2 = arith.constant 0 : i32
    return %c0_i32, %c0_i32_0, %c0_i32_1 : i32, i32, i32
  }
  func.func @transform_15(%arg0: i32) -> (i32, i32, i32) {
    %c0_i32 = arith.constant 0 : i32
    %c0_i32_0 = arith.constant 0 : i32
    %c0_i32_1 = arith.constant 0 : i32
    %c0_i32_2 = arith.constant 0 : i32
    return %c0_i32, %c0_i32_0, %c0_i32_1 : i32, i32, i32
  }
  func.func @transform_16(%arg0: i32) -> (i32, i32) {
    %c0_i32 = arith.constant 0 : i32
    %c0_i32_0 = arith.constant 0 : i32
    %c0_i32_1 = arith.constant 0 : i32
    return %c0_i32, %c0_i32_0 : i32, i32
  }
  func.func @transform_17(%arg0: i32) -> (i32, i32) {
    %c0_i32 = arith.constant 0 : i32
    %c0_i32_0 = arith.constant 0 : i32
    %c0_i32_1 = arith.constant 0 : i32
    return %c0_i32, %c0_i32_0 : i32, i32
  }
  func.func @transform_18(%arg0: i32) -> (i32, i32) {
    %c0_i32 = arith.constant 0 : i32
    %c0_i32_0 = arith.constant 0 : i32
    %c0_i32_1 = arith.constant 0 : i32
    return %c0_i32, %c0_i32_0 : i32, i32
  }
  func.func @transform_19(%arg0: i32) -> (i32, i32) {
    %c0_i32 = arith.constant 0 : i32
    %c0_i32_0 = arith.constant 0 : i32
    return %arg0, %c0_i32 : i32, i32
  }
}

</mosaic_0001>

<bundles_post_ra>
// kernel: gpt_forward.1
= control target key start
LH: loop header
LB: loop body
LE: loop exit
PB: predicated region body
PF: predicated region fallthrough
CT: control target
= control target key end

     0   :  { %s6021_s0 = inlined_call_operand.vmem [shape: f32[16,128], index: 0, kind: input, shape index: {}]   ;;  %s6022_s1 = inlined_call_operand.vmem [shape: f32[8,128], index: 1, kind: input, shape index: {}]   ;;  %s6023_s2 = inlined_call_operand.hbm [shape: f32[8,128], index: 2, kind: input, shape index: {}]   ;;  %s6024_s3 = inlined_call_operand.hbm [shape: f32[8,8], index: 3, kind: input, shape index: {}]   ;;  %s6025_s4 = inlined_call_operand.hbm [shape: f32[4,128], index: 4, kind: input, shape index: {}]   ;;  %s6026_s5 = inlined_call_operand.vmem [shape: f32[1,128], index: 5, kind: input, shape index: {}]   ;;  %s6027_s6 = inlined_call_operand.vmem [shape: f32[2,1,128], index: 6, kind: input, shape index: {}]   ;;  %s6028_s7 = inlined_call_operand.vmem [shape: bf16[2,128,640], index: 7, kind: input, shape index: {}]   ;;  %s6029_s8 = inlined_call_operand.vmem [shape: f32[2,1,640], index: 8, kind: input, shape index: {}]   ;;  %s6030_s9 = inlined_call_operand.vmem [shape: bf16[2,128,128], index: 9, kind: input, shape index: {}]   ;;  %s6031_s10 = inlined_call_operand.vmem [shape: f32[2,1,128], index: 10, kind: input, shape index: {}]   ;;  %s6032_s11 = inlined_call_operand.hbm [shape: f32[2,1,128], index: 11, kind: input, shape index: {}]   ;;  %s6033_s12 = inlined_call_operand.vmem [shape: bf16[2,128,128], index: 12, kind: input, shape index: {}]   ;;  %s6034_s13 = inlined_call_operand.vmem [shape: f32[2,1,128], index: 13, kind: input, shape index: {}]   ;;  %s6035_s14 = inlined_call_operand.hbm [shape: bf16[2,128,128], index: 14, kind: input, shape index: {}]   ;;  %s6036_s15 = inlined_call_operand.vmem [shape: f32[2,1,128], index: 15, kind: input, shape index: {}]   ;;  %s6037_s16 = inlined_call_operand.hbm [shape: f32[1,128], index: 16, kind: input, shape index: {}]   ;;  %s6038_s17 = inlined_call_operand.hbm [shape: f32[1,128], index: 17, kind: input, shape index: {}]   ;;  %s6039_s18 = inlined_call_operand.hbm [shape: bf16[128,512], index: 18, kind: input, shape index: {}]   ;;  %s6040_s19 = inlined_call_operand.hbm [shape: f32[16,512], index: 19, kind: output, shape index: {}]  }
   0x1   :  { %6058 = sst [smem:[#allocation31_spill]] %s6021_s0 }
   0x2   :  { %6059 = sst [smem:[#allocation32_spill]] %s6022_s1 }
   0x3   :  { %6060 = sst [smem:[#allocation33_spill]] %s6023_s2 }
   0x4   :  { %6061 = sst [smem:[#allocation34_spill]] %s6024_s3 }
   0x5   :  { %6062 = sst [smem:[#allocation35_spill]] %s6025_s4 }
   0x6   :  { %6063 = sst [smem:[#allocation36_spill]] %s6026_s5 }
   0x7   :  { %6064 = sst [smem:[#allocation37_spill]] %s6032_s11 }
   0x8   :  { %6065 = sst [smem:[#allocation38_spill]] %s6040_s19 }
   0x9   :  { %24 = vsyncpa [#allocation3], 0 }
   0xa   :  { %25 = vsyncpa [#allocation6], 0 }
   0xb   :  { %26 = vsyncpa [#allocation9], 0 }
   0xc   :  { %27 = vsyncpa [#allocation12], 0 }
   0xd   :  { %28 = vsyncpa [#allocation15], 0 }
   0xe   :  { %29 = vsyncpa [#allocation4], 0 }
   0xf   :  { %31 = vsyncpa [#allocation4 + $0x1], 0  ;;  %s5050_s0 = smov 0   ;;  %s5052_s30 = smov 0  }
  0x10   :  { %s5054_s20 = smov 0   ;;  %s5056_s21 = smov 0  }
  0x11 LB: > { %6066 = sst [smem:[#allocation23_spill]] %s4919_s0  ;;  %s5071_s1 = sadd.s32 4294967295, %s4931_s21   ;;  %s4931_s21 = sphi %s5056_s21, %s6107_s21   ;;  %s4927_s20 = sphi %s5054_s20, %s6110_s20   ;;  %s4923_s30 = sphi %s5052_s30, %s6109_s30   ;;  %s4919_s0 = sphi %s5050_s0, %s6108_s0  }
  0x12   : > { %6067 = sst [smem:[#allocation24_spill]] %s4923_s30  ;;  %s3582_s22 = sadd.s32 4294967294, %s4931_s21  }
  0x13   : > { %6068 = sst [smem:[#allocation25_spill]] %s4927_s20  ;;  %s5075_s2 = sadd.s32 1, %s4931_s21  }
  0x14   : > { %6069 = sst [smem:[#allocation26_spill]] %s4931_s21  ;;  %s448_s23 = sadd.s32 1, %s4927_s20 }
  0x15   : > { %6070 = sst [smem:[#allocation27_spill]] %s5075_s2  ;;  %s445_s24 = ssub.s32 %s4931_s21, %s5075_s2 }
  0x16   : > { %p458_p0 = scmp.ne.s32.totalorder %s4927_s20, %s4923_s30  ;;  %p446_p1 = scmp.eq.s32.totalorder %s445_s24, 0 }
  0x17   : > { %p459_p2 = scmp.eq.s32.totalorder %s5071_s1, 1  ;;  %p464_p3 = scmp.ne.s32.totalorder %s4923_s30, %s4919_s0 }
  0x18   : > { %p465_p4 = scmp.eq.s32.totalorder %s3582_s22, 1  ;;  %p3583_p7 = scmp.ge.s32.totalorder %s4931_s21, 1 }
  0x19   : > { %s5086_s25 = scalar_select %p446_p1, %s4927_s20, %s448_s23  }
  0x1a   : > { %p5088_p5 = por %p459_p2, %p458_p0  ;;  %p5092_p6 = por %p465_p4, %p464_p3 }
  0x1b   : > { %6071 = sst [smem:[#allocation28_spill]] %s5086_s25  ;;  %p472_p8 = scmp.lt.s32.totalorder %s4931_s21, 3 }
  0x1c   : > { %s6072_s3 = scalar_select %p5088_p5, 1, 0 }
  0x1d   : > { %s6074_s26 = scalar_select %p5092_p6, 1, 0 }
  0x1e   : > { %6073 = sst [smem:[#allocation29_spill]] %s6072_s3  ;;  %p6053_p9 = scmp.eq.s32.totalorder %s5071_s1, 0 }
  0x1f   : > { %6075 = sst [smem:[#allocation30_spill]] %s6074_s26  ;;  %p5099_p10 = pnand %p3583_p7, %p472_p8 }
  0x20   : > { %s4933_s28 = smov [#allocation5]   ;;  %s4934_s22 = smov [#allocation8]  }
  0x21   : > { %s6076_s27 = scalar_select %p5099_p10, 1, 0 }
  0x22   : > { %s499_s29 = sshll.u32 %s4933_s28, 4  ;;  %p4272_p11 = pneg %p5099_p10  ;;  %s500_s29 = int_to_ptr.vmem [resolvable:$true] %s499_s29 }
  0x23   : > { %s538_s23 = sshll.u32 %s4934_s22, 4  ;;  %s4935_s25 = smov [#allocation11]   ;;  %s5111_s23 = int_to_ptr.vmem [resolvable:$true] %s538_s23 }
  0x24   : > { %p5107_p12 = pnand %p6053_p9, %p4272_p11  ;;  %s5113_s20 = sshll.u32 %s4935_s25, 4  ;;  %s575_s20 = int_to_ptr.vmem [resolvable:$true] %s5113_s20 }
  0x25   : > { %s6078_s0 = sld [smem:[#allocation34_spill]] }
  0x26   : > { %p5123_p0 = pneg %p5107_p12 }
  0x2b   : > { %s6079_s19 = smov %s6078_s0  ;;  %s4625_s28 = scalar_lea.hbm %s6078_s0, 128 }
  0x2c   : > { %p4626_p13 = scmp.ne.s32.totalorder %s6079_s19, %s4625_s28  ;;  %p4632_p3 = scmp.lt.u32.totalorder %s4625_s28, %s6079_s19 }
  0x2e   : > { %p4628_p1 = pnand %p5123_p0, %p4626_p13 }
  0x30   : > { %p4629_p2 = pneg %p4628_p1 }
  0x32   : > { %p4634_p4 = pnand %p4632_p3, %p4629_p2 }
  0x34   : > { %4637 = shalt.err (!%p4634_p4)
}
  0x35   : > { %s4638_s0 = scalar_lea.vmem %s500_s29, 128  ;;  %p4646_p9 = scmp.lt.s32.totalorder %s500_s29, %s500_s29 }
  0x36   : > { %p4639_p7 = scmp.ne.s32.totalorder %s500_s29, %s4638_s0  ;;  %p4647_p6 = scmp.lt.s32.totalorder %s4638_s0, %s4638_s0 }
  0x38   : > { %p4641_p8 = pnand %p4639_p7, %p5123_p0  ;;  %p4648_p5 = por %p4647_p6, %p4646_p9 }
  0x3a   : > { %p4642_p11 = pneg %p4641_p8 }
  0x3c   : > { %p4649_p10 = pnand %p4648_p5, %p4642_p11 }
  0x3e   : > { %4652 = shalt.err (!%p4649_p10)
}
  0x3f   : > { %4278 = dma.hbm_to_vmem [thread:$0]  (!%p5107_p12), %s6079_s19, 128, %s500_s29, [#allocation6]  }
  0x40   : > { %s6081_s11 = sld [smem:[#allocation37_spill]] }
  0x46   : > { %s4653_s26 = scalar_lea.hbm %s6081_s11, 32 }
  0x47   : > { %p4654_p13 = scmp.ne.s32.totalorder %s6081_s11, %s4653_s26  ;;  %p4660_p5 = scmp.lt.u32.totalorder %s4653_s26, %s6081_s11 }
  0x49   : > { %p4656_p1 = pnand %p4654_p13, %p5123_p0 }
  0x4b   : > { %p4657_p6 = pneg %p4656_p1 }
  0x4d   : > { %p4662_p9 = pnand %p4660_p5, %p4657_p6 }
  0x4f   : > { %4665 = shalt.err (!%p4662_p9)
}
  0x50   : > { %s4666_s29 = scalar_lea.vmem %s5111_s23, 32  ;;  %p4674_p4 = scmp.lt.s32.totalorder %s5111_s23, %s5111_s23 }
  0x51   : > { %p4667_p10 = scmp.ne.s32.totalorder %s5111_s23, %s4666_s29  ;;  %p4675_p7 = scmp.lt.s32.totalorder %s4666_s29, %s4666_s29 }
  0x53   : > { %p4669_p2 = pnand %p4667_p10, %p5123_p0  ;;  %p4676_p8 = por %p4675_p7, %p4674_p4 }
  0x55   : > { %p4670_p3 = pneg %p4669_p2 }
  0x57   : > { %p4677_p11 = pnand %p4676_p8, %p4670_p3 }
  0x59   : > { %4680 = shalt.err (!%p4677_p11)
}
  0x5a   : > { %s6057_s21 = smov 16   ;;  %s4937_s5 = smov 1  }
  0x5b   : > { %4284 = dma.hbm_to_vmem [thread:$0]  (!%p5107_p12), %s6081_s11, 32, %s5111_s23, [#allocation9], %s6057_s21, %s6057_s21, %s4937_s5  }
  0x5c   : > { %s4681_s28 = scalar_lea.hbm %s6037_s16, 16 }
  0x5d   : > { %p4682_p13 = scmp.ne.s32.totalorder %s6037_s16, %s4681_s28  ;;  %p4688_p5 = scmp.lt.u32.totalorder %s4681_s28, %s6037_s16 }
  0x5f   : > { %p4684_p1 = pnand %p4682_p13, %p5123_p0 }
  0x61   : > { %p4685_p6 = pneg %p4684_p1 }
  0x63   : > { %p4690_p9 = pnand %p4688_p5, %p4685_p6 }
  0x65   : > { %4693 = shalt.err (!%p4690_p9)
}
  0x66   : > { %s4694_s2 = scalar_lea.vmem %s575_s20, 16  ;;  %s4701_s23 = scalar_lea.vmem %s575_s20, 32 }
  0x67   : > { %p4695_p10 = scmp.ne.s32.totalorder %s575_s20, %s4694_s2  ;;  %p4702_p4 = scmp.lt.s32.totalorder %s575_s20, %s575_s20 }
  0x68   : > { %p4703_p7 = scmp.lt.s32.totalorder %s4701_s23, %s4694_s2 }
  0x69   : > { %p4697_p2 = pnand %p4695_p10, %p5123_p0 }
  0x6a   : > { %p4704_p8 = por %p4703_p7, %p4702_p4 }
  0x6b   : > { %p4698_p3 = pneg %p4697_p2 }
  0x6d   : > { %p4705_p11 = pnand %p4704_p8, %p4698_p3 }
  0x6f   : > { %4708 = shalt.err (!%p4705_p11)
}
  0x70   : > { %4290 = dma.hbm_to_vmem [thread:$0]  (!%p5107_p12), %s6037_s16, 16, %s575_s20, [#allocation12]  }
  0x71   : > { %s4938_s19 = smov [#allocation2]   ;;  %s4939_s26 = smov [#allocation7]  }
  0x72   : > { %s488_s3 = sshll.u32 %s4938_s19, 4  ;;  %s510_s28 = sshll.u32 %s4939_s26, 4  ;;  %s489_s3 = int_to_ptr.vmem [resolvable:$true] %s488_s3  ;;  %s511_s28 = int_to_ptr.vmem [resolvable:$true] %s510_s28 }
  0x73   : > { %s6082_s29 = sld [smem:[#allocation33_spill]] }
  0x79   : > { %s4709_s21 = scalar_lea.hbm %s6082_s29, 128 }
  0x7a   : > { %p4710_p13 = scmp.ne.s32.totalorder %s6082_s29, %s4709_s21  ;;  %p4716_p5 = scmp.lt.u32.totalorder %s4709_s21, %s6082_s29 }
  0x7c   : > { %p4712_p1 = pnand %p4710_p13, %p5123_p0 }
  0x7e   : > { %p4713_p6 = pneg %p4712_p1 }
  0x80   : > { %p4718_p9 = pnand %p4716_p5, %p4713_p6 }
  0x82   : > { %4721 = shalt.err (!%p4718_p9)
}
  0x83   : > { %s4722_s20 = scalar_lea.vmem %s489_s3, 128  ;;  %p4730_p4 = scmp.lt.s32.totalorder %s489_s3, %s489_s3 }
  0x84   : > { %p4723_p10 = scmp.ne.s32.totalorder %s489_s3, %s4722_s20  ;;  %p4731_p7 = scmp.lt.s32.totalorder %s4722_s20, %s4722_s20 }
  0x86   : > { %p4725_p2 = pnand %p4723_p10, %p5123_p0  ;;  %p4732_p8 = por %p4731_p7, %p4730_p4 }
  0x88   : > { %p4726_p3 = pneg %p4725_p2 }
  0x8a   : > { %p4733_p11 = pnand %p4732_p8, %p4726_p3 }
  0x8c   : > { %4736 = shalt.err (!%p4733_p11)
}
  0x8d   : > { %4275 = dma.hbm_to_vmem [thread:$0]  (!%p5107_p12), %s6082_s29, 128, %s489_s3, [#allocation3]  }
  0x8e   : > { %s6083_s4 = sld [smem:[#allocation35_spill]] }
  0x94   : > { %s4737_s26 = scalar_lea.hbm %s6083_s4, 64 }
  0x95   : > { %p4738_p13 = scmp.ne.s32.totalorder %s6083_s4, %s4737_s26  ;;  %p4744_p5 = scmp.lt.u32.totalorder %s4737_s26, %s6083_s4 }
  0x97   : > { %p4740_p1 = pnand %p4738_p13, %p5123_p0 }
  0x99   : > { %p4741_p6 = pneg %p4740_p1 }
  0x9b   : > { %p4746_p9 = pnand %p4744_p5, %p4741_p6 }
  0x9d   : > { %4749 = shalt.err (!%p4746_p9)
}
  0x9e   : > { %s4750_s5 = scalar_lea.vmem %s511_s28, 64  ;;  %p4758_p4 = scmp.lt.s32.totalorder %s511_s28, %s511_s28 }
  0x9f   : > { %p4751_p10 = scmp.ne.s32.totalorder %s511_s28, %s4750_s5  ;;  %p4759_p7 = scmp.lt.s32.totalorder %s4750_s5, %s4750_s5 }
  0xa1   : > { %p4753_p2 = pnand %p4751_p10, %p5123_p0  ;;  %p4760_p8 = por %p4759_p7, %p4758_p4 }
  0xa3   : > { %p4754_p3 = pneg %p4753_p2 }
  0xa5   : > { %p4761_p11 = pnand %p4760_p8, %p4754_p3 }
  0xa7   : > { %4764 = shalt.err (!%p4761_p11)
}
  0xa8   : > { %4281 = dma.hbm_to_vmem [thread:$0]  (!%p5107_p12), %s6083_s4, 64, %s511_s28, [#allocation6]  }
  0xa9   : > { %s4940_s30 = smov [#allocation10]   ;;  %s4765_s26 = scalar_lea.hbm %s6035_s14, 2048 }
  0xaa   : > { %s557_s19 = sshll.u32 %s4940_s30, 4  ;;  %p4766_p13 = scmp.ne.s32.totalorder %s6035_s14, %s4765_s26  ;;  %s558_s19 = int_to_ptr.vmem [resolvable:$true] %s557_s19 }
  0xab   : > { %p4772_p5 = scmp.lt.u32.totalorder %s4765_s26, %s6035_s14 }
  0xac   : > { %p4768_p1 = pnand %p4766_p13, %p5123_p0 }
  0xae   : > { %p4769_p6 = pneg %p4768_p1 }
  0xb0   : > { %p4774_p9 = pnand %p4772_p5, %p4769_p6 }
  0xb2   : > { %4777 = shalt.err (!%p4774_p9)
}
  0xb3   : > { %s4778_s28 = scalar_lea.vmem %s558_s19, 2048  ;;  %p4786_p4 = scmp.lt.s32.totalorder %s558_s19, %s558_s19 }
  0xb4   : > { %p4779_p10 = scmp.ne.s32.totalorder %s558_s19, %s4778_s28  ;;  %p4787_p7 = scmp.lt.s32.totalorder %s4778_s28, %s4778_s28 }
  0xb6   : > { %p4781_p2 = pnand %p4779_p10, %p5123_p0  ;;  %p4788_p8 = por %p4787_p7, %p4786_p4 }
  0xb8   : > { %p4782_p3 = pneg %p4781_p2 }
  0xba   : > { %p4789_p11 = pnand %p4788_p8, %p4782_p3 }
  0xbc   : > { %4792 = shalt.err (!%p4789_p11)
}
  0xbd   : > { %s4941_s5 = smov 64   ;;  %s4942_s3 = smov 4  }
  0xbe   : > { %4287 = dma.hbm_to_vmem [thread:$0]  (!%p5107_p12), %s6035_s14, 2048, %s558_s19, [#allocation9], %s4941_s5, %s4941_s5, %s4942_s3  }
  0xbf   : > { %s4943_s11 = smov [#allocation13]   ;;  %s4944_s26 = smov [#allocation14]  }
  0xc0   : > { %s585_s21 = sshll.u32 %s4943_s11, 4  ;;  %s595_s25 = sshll.u32 %s4944_s26, 4  ;;  %s586_s21 = int_to_ptr.vmem [resolvable:$true] %s585_s21  ;;  %s5237_s25 = int_to_ptr.vmem [resolvable:$true] %s595_s25 }
  0xc1   : > { %s4793_s23 = scalar_lea.hbm %s6038_s17, 16 }
  0xc2   : > { %p4794_p13 = scmp.ne.s32.totalorder %s6038_s17, %s4793_s23  ;;  %p4800_p5 = scmp.lt.u32.totalorder %s4793_s23, %s6038_s17 }
  0xc4   : > { %p4796_p1 = pnand %p4794_p13, %p5123_p0 }
  0xc6   : > { %p4797_p6 = pneg %p4796_p1 }
  0xc8   : > { %p4802_p9 = pnand %p4800_p5, %p4797_p6 }
  0xca   : > { %4805 = shalt.err (!%p4802_p9)
}
  0xcb   : > { %s4806_s5 = scalar_lea.vmem %s586_s21, 16  ;;  %s4813_s3 = scalar_lea.vmem %s586_s21, 32 }
  0xcc   : > { %p4807_p10 = scmp.ne.s32.totalorder %s586_s21, %s4806_s5  ;;  %p4814_p4 = scmp.lt.s32.totalorder %s586_s21, %s586_s21 }
  0xcd   : > { %p4815_p7 = scmp.lt.s32.totalorder %s4813_s3, %s4806_s5 }
  0xce   : > { %p4809_p2 = pnand %p4807_p10, %p5123_p0 }
  0xcf   : > { %p4816_p8 = por %p4815_p7, %p4814_p4 }
  0xd0   : > { %p4810_p3 = pneg %p4809_p2 }
  0xd2   : > { %p4817_p11 = pnand %p4816_p8, %p4810_p3 }
  0xd4   : > { %4820 = shalt.err (!%p4817_p11)
}
  0xd5   : > { %4293 = dma.hbm_to_vmem [thread:$0]  (!%p5107_p12), %s6038_s17, 16, %s586_s21, [#allocation12]  }
  0xd6   : > { %s4821_s0 = scalar_lea.hbm %s6039_s18, 4096 }
  0xd7   : > { %p4822_p13 = scmp.ne.s32.totalorder %s6039_s18, %s4821_s0  ;;  %p4828_p5 = scmp.lt.u32.totalorder %s4821_s0, %s6039_s18 }
  0xd9   : > { %p4824_p1 = pnand %p4822_p13, %p5123_p0 }
  0xdb   : > { %p4825_p6 = pneg %p4824_p1 }
  0xdd   : > { %p4830_p9 = pnand %p4828_p5, %p4825_p6 }
  0xdf   : > { %4833 = shalt.err (!%p4830_p9)
}
  0xe0   : > { %s4834_s21 = scalar_lea.vmem %s5237_s25, 4096  ;;  %p4842_p4 = scmp.lt.s32.totalorder %s5237_s25, %s5237_s25 }
  0xe1   : > { %p4835_p10 = scmp.ne.s32.totalorder %s5237_s25, %s4834_s21  ;;  %p4843_p7 = scmp.lt.s32.totalorder %s4834_s21, %s4834_s21 }
  0xe3   : > { %p4837_p2 = pnand %p4835_p10, %p5123_p0  ;;  %p4844_p8 = por %p4843_p7, %p4842_p4 }
  0xe5   : > { %p4838_p3 = pneg %p4837_p2 }
  0xe7   : > { %p4845_p11 = pnand %p4844_p8, %p4838_p3 }
  0xe9   : > { %4848 = shalt.err (!%p4845_p11)
}
  0xea   : > { %s4945_s19 = smov 256   ;;  %s6084_s5 = smov 16  }
  0xeb   : > { %4296 = dma.hbm_to_vmem [thread:$0]  (!%p5107_p12), %s6039_s18, 4096, %s5237_s25, [#allocation15], %s4945_s19, %s4945_s19, %s6084_s5  }
  0xec   : > { %p6085_p13 = scmp.ne.s32.totalorder %s6076_s27, 0 }
  0xed   : > { %p6086_p0 = scmp.eq.s32.totalorder (!%p6085_p13), %s5071_s1, 0 }
  0xee   : > { %618 = sbr.rel (%p6085_p13) target bundleno = 6473 (0x1949), region = 96 }
  0xf5   : > { %4894 = dma.done.wait (%p6086_p0), [#allocation3], 128   ;;  %p6087_p1 = pmov %p6086_p0 }
  0xf6   : > { %p6088_p6 = pmov %p6086_p0 }
  0xf7   : > { %4896 = vsyncadd (%p6087_p1), [#allocation3], 4294967168 }
  0xf8   : > { %4898 = dma.done.wait (%p6088_p6), [#allocation6], 192   ;;  %p6089_p5 = pmov %p6086_p0 }
  0xf9   : > { %p6090_p9 = pmov %p6086_p0 }
  0xfa   : > { %4900 = vsyncadd (%p6089_p5), [#allocation6], 4294967104 }
  0xfb   : > { %4902 = dma.done.wait (%p6090_p9), [#allocation9], 2080   ;;  %p6091_p12 = pmov %p6086_p0 }
  0xfc   : > { %p6092_p10 = pmov %p6086_p0 }
  0xfd   : > { %4904 = vsyncadd (%p6091_p12), [#allocation9], 4294965216 }
  0xfe   : > { %4906 = dma.done.wait (%p6092_p10), [#allocation12], 32   ;;  %p6093_p2 = pmov %p6086_p0 }
  0xff   : > { %p6094_p3 = pmov %p6086_p0 }
 0x100   : > { %4908 = vsyncadd (%p6093_p2), [#allocation12], 4294967264 }
 0x101   : > { %4910 = dma.done.wait (%p6094_p3), [#allocation15], 4096   ;;  %p6095_p4 = pmov %p6086_p0 }
 0x102   : > { %p701_p7 = scmp.lt.s32.totalorder %s5071_s1, 1  ;;  %s6096_s30 = sld [smem:[#allocation31_spill]]  ;;  %v4366_v2 = vld [vmem:[%s6028_s7 + $0x4] ss:$20 sps:$4 sm:$0xff]   ;;  %v4368_v3 = vld [vmem:[%s6028_s7] ss:$20 sps:$4 sm:$0xff]   ;;  %v777_v52 = vlaneseq }
 0x103   : > { %4912 = vsyncadd (%p6095_p4), [#allocation15], 4294963200  ;;  %v4369_v4 = vld [vmem:[%s6028_s7 + $0xc] ss:$20 sps:$4 sm:$0xff]   ;;  %v4371_v5 = vld [vmem:[%s6028_s7 + $0x8] ss:$20 sps:$4 sm:$0xff]   ;;  %1010 = vmatprep.subr.bf16.mxu0 %v4366_v2 }
 0x104   : > { %s702_s27 = scalar_select %p701_p7, %s5071_s1, 1  ;;  %v4372_v6 = vld [vmem:[%s6028_s7 + $0x2c] ss:$20 sps:$4 sm:$0xff]   ;;  %1011 = vmatpush1.bf16.msra.mxu0 %v4368_v3  ;;  %1051 = vmatprep.subr.bf16.mxu1 %v4369_v4  ;;  %v4374_v7 = vld [vmem:[%s6028_s7 + $0x28] ss:$20 sps:$4 sm:$0xff]   ;;  %v4946_v32 = vmov 0  }
 0x105   : > { %1052 = vmatpush1.bf16.msra.mxu1 %v4371_v5  ;;  %1012 = vmatprep.subr.bf16.mxu0 %v4372_v6  ;;  %v4375_v8 = vld [vmem:[%s6028_s7 + $0x34] ss:$20 sps:$4 sm:$0xff]   ;;  %v4377_v9 = vld [vmem:[%s6028_s7 + $0x30] ss:$20 sps:$4 sm:$0xff]   ;;  %v4383_v13 = vld [vmem:[%s6028_s7 + $0x58] ss:$20 sps:$4 sm:$0xff]  }
 0x106   : > { %s3603_s24 = sshll.u32 %s702_s27, 3  ;;  %v4378_v10 = vld [vmem:[%s6028_s7 + $0x54] ss:$20 sps:$4 sm:$0xff]   ;;  %v4380_v11 = vld [vmem:[%s6028_s7 + $0x50] ss:$20 sps:$4 sm:$0xff]   ;;  %1053 = vmatprep.subr.bf16.mxu1 %v4375_v8  ;;  %1042 = vmatprep.mubr.bf16.mxu0 %v4946_v32  ;;  %v4947_v35 = vmov 0.0  }
 0x107   : > { %v4381_v12 = vld [vmem:[%s6028_s7 + $0x5c] ss:$20 sps:$4 sm:$0xff]   ;;  %v4386_v15 = vld [vmem:[%s6028_s7 + $0x78] ss:$20 sps:$4 sm:$0xff]   ;;  %v4389_v17 = vld [vmem:[%s6028_s7 + $0x80] ss:$20 sps:$4 sm:$0xff]   ;;  %1083 = vmatprep.mubr.bf16.mxu1 %v4946_v32 }
 0x108   : > { %s5308_s11 = scalar_lea.vmem %s6096_s30, %s3603_s24  ;;  %1013 = vmatpush1.bf16.msra.mxu0 %v4374_v7  ;;  %v4384_v14 = vld [vmem:[%s6028_s7 + $0x7c] ss:$20 sps:$4 sm:$0xff]   ;;  %v4387_v16 = vld [vmem:[%s6028_s7 + $0x84] ss:$20 sps:$4 sm:$0xff]   ;;  %v4392_v19 = vld [vmem:[%s6028_s7 + $0xa0] ss:$20 sps:$4 sm:$0xff]  }
 0x109   : > { %v5311_v0 = vld [vmem:[%s5308_s11] sm:$0xff]  ;;  %1054 = vmatpush1.bf16.msra.mxu1 %v4377_v9  ;;  %1014 = vmatprep.subr.bf16.mxu0 %v4378_v10  ;;  %v4395_v21 = vld [vmem:[%s6028_s7 + $0xa8] ss:$20 sps:$4 sm:$0xff]   ;;  %v4407_v29 = vld [vmem:[%s6028_s7 + $0xf8] ss:$20 sps:$4 sm:$0xff]   ;;  %vm4948_vm0 = vmmov 0  }
 0x10a   : > { %v711_v1 = vmul.f32 %v5311_v0, %v5311_v0  ;;  %1055 = vmatprep.subr.bf16.mxu1 %v4381_v12  ;;  %v4390_v18 = vld [vmem:[%s6028_s7 + $0xa4] ss:$20 sps:$4 sm:$0xff]   ;;  %v4393_v20 = vld [vmem:[%s6028_s7 + $0xac] ss:$20 sps:$4 sm:$0xff]   ;;  %v4398_v23 = vld [vmem:[%s6028_s7 + $0xc8] ss:$20 sps:$4 sm:$0xff]  }
 0x10b   : > { %v4396_v22 = vld [vmem:[%s6028_s7 + $0xcc] ss:$20 sps:$4 sm:$0xff]   ;;  %v4399_v24 = vld [vmem:[%s6028_s7 + $0xd4] ss:$20 sps:$4 sm:$0xff]   ;;  %v4401_v25 = vld [vmem:[%s6028_s7 + $0xd0] ss:$20 sps:$4 sm:$0xff]  }
 0x10c   : > { %712 = vadd.xlane.f32.xlu0 %v711_v1  ;;  %1015 = vmatpush1.bf16.msra.mxu0 %v4380_v11  ;;  %v4402_v26 = vld [vmem:[%s6028_s7 + $0xf4] ss:$20 sps:$4 sm:$0xff]   ;;  %v4404_v27 = vld [vmem:[%s6028_s7 + $0xf0] ss:$20 sps:$4 sm:$0xff]   ;;  %v4410_v33 = vld [vmem:[%s6028_s7 + $0x118] ss:$20 sps:$4 sm:$0xff]  }
 0x10d   : > { %1056 = vmatpush1.bf16.msra.mxu1 %v4383_v13  ;;  %1016 = vmatprep.subr.bf16.mxu0 %v4384_v14  ;;  %v4405_v28 = vld [vmem:[%s6028_s7 + $0xfc] ss:$20 sps:$4 sm:$0xff]   ;;  %v4411_v31 = vld [vmem:[%s6028_s7 + $0x124] ss:$20 sps:$4 sm:$0xff]   ;;  %v4413_v34 = vld [vmem:[%s6028_s7 + $0x120] ss:$20 sps:$4 sm:$0xff]  }
 0x10e   : > { %1057 = vmatprep.subr.bf16.mxu1 %v4387_v16  ;;  %v4408_v30 = vld [vmem:[%s6028_s7 + $0x11c] ss:$20 sps:$4 sm:$0xff]   ;;  %v3604_v40 = vld [vmem:[%s6027_s6] ss:$0 sm:$0xff]  ;;  %v4415_v45 = vld [vmem:[%s6028_s7 + $0x38] ss:$20 sps:$4 sm:$0xff]  }
 0x10f   : > { %v4414_v43 = vld [vmem:[%s6028_s7 + $0x10] ss:$20 sps:$4 sm:$0xff]   ;;  %v4416_v46 = vld [vmem:[%s6028_s7 + $0x60] ss:$20 sps:$4 sm:$0xff]   ;;  %v4417_v47 = vld [vmem:[%s6028_s7 + $0x88] ss:$20 sps:$4 sm:$0xff]  }
 0x110   : > { %1017 = vmatpush1.bf16.msra.mxu0 %v4386_v15  ;;  %v4418_v48 = vld [vmem:[%s6028_s7 + $0xb0] ss:$20 sps:$4 sm:$0xff]   ;;  %v4419_v49 = vld [vmem:[%s6028_s7 + $0xd8] ss:$20 sps:$4 sm:$0xff]   ;;  %v4420_v50 = vld [vmem:[%s6028_s7 + $0x100] ss:$20 sps:$4 sm:$0xff]  }
 0x111   : > { %1058 = vmatpush1.bf16.msra.mxu1 %v4389_v17  ;;  %1018 = vmatprep.subr.bf16.mxu0 %v4390_v18  ;;  %v4421_v51 = vld [vmem:[%s6028_s7 + $0x128] ss:$20 sps:$4 sm:$0xff]   ;;  %v5457_v53 = vshrl.u32 %v777_v52, 7  ;;  %v775_v55 = vld [vmem:[%s6029_s8] sm:$0x1f]  ;;  %s6097_s21 = sld [smem:[#allocation32_spill]] }
 0x112   : > { %1059 = vmatprep.subr.bf16.mxu1 %v4393_v20  ;;  %v5491_v20 = vld [vmem:[#allocation7] sm:$0xf]  ;;  %vm1202_vm1 = vcmask 1043456   ;;  %vm1186_vm2 = vcmask 64512   ;;  %s6098_s0 = sld [smem:[#allocation36_spill]]  ;;  %s6099_s2 = sld [smem:[#allocation24_spill]] }
 0x113   : > { %v5460_v54 = vsub.s32 0, %v5457_v53  ;;  %v5466_v56 = vsub.s32 3, %v5457_v53  ;;  %v5482_v10 = vsub.s32 1, %v5457_v53  ;;  %v795_v11 = vsub.s32 4, %v5457_v53  ;;  %s6100_s19 = sld [smem:[#allocation29_spill]]  ;;  %s6101_s4 = sld [smem:[#allocation38_spill]] }
 0x114   : > { %1019 = vmatpush1.bf16.msra.mxu0 %v4392_v19  ;;  %v5489_v15 = vsub.s32 2, %v5457_v53  ;;  %s4949_s22 = smov [#allocation16]  }
 0x115   : > { %1060 = vmatpush1.bf16.msra.mxu1 %v4395_v21  ;;  %1020 = vmatprep.subr.bf16.mxu0 %v4396_v22  ;;  %v780_v57 = vrot.slane %v775_v55, %v5460_v54  ;;  %v792_v58 = vrot.slane %v775_v55, %v5466_v56  ;;  %v784_v12 = vrot.slane %v775_v55, %v5482_v10  ;;  %s4853_s25 = sshll.u32 %s4949_s22, 4  ;;  %s4854_s25 = int_to_ptr.vmem [resolvable:$false] %s4853_s25 }
 0x116   : > { %1061 = vmatprep.subr.bf16.mxu1 %v4399_v24  ;;  %v796_v13 = vrot.slane %v775_v55, %v795_v11  ;;  %v788_v24 = vrot.slane %v775_v55, %v5489_v15  ;;  %s4855_s30 = scalar_lea.vmem %s4854_s25, 1024 }
 0x117   : > { %v5473_v59 = vld [vmem:[%s6097_s21] sm:$0xff]  ;;  %s3877_s21 = sshll.u32 %s5071_s1, 9 }
 0x118   : > { %1021 = vmatpush1.bf16.msra.mxu0 %v4398_v23 }
 0x119   : > { %1062 = vmatpush1.bf16.msra.mxu1 %v4401_v25  ;;  %1022 = vmatprep.subr.bf16.mxu0 %v4402_v26  ;;  %v5498_v26 = vrot.slane %v5491_v20, %v5460_v54  ;;  %s5981_s27 = scalar_lea.hbm %s6101_s4, %s3877_s21  ;;  %p6102_p11 = scmp.ne.s32.totalorder %s6100_s19, 0 }
 0x11a   : > { %1063 = vmatprep.subr.bf16.mxu1 %v4405_v28 }
 0x11c   : > { %1023 = vmatpush1.bf16.msra.mxu0 %v4404_v27 }
 0x11d   : > { %1064 = vmatpush1.bf16.msra.mxu1 %v4407_v29  ;;  %1024 = vmatprep.subr.bf16.mxu0 %v4408_v30 }
 0x11e   : > { %1065 = vmatprep.subr.bf16.mxu1 %v4411_v31 }
 0x120   : > { %1025 = vmatpush1.bf16.msra.mxu0 %v4410_v33 }
 0x121   : > { %1066 = vmatpush1.bf16.msra.mxu1 %v4413_v34  ;;  %3982 = vmatprep.subr.bf16.mxu0 %v4947_v35  ;;  %v5513_v34 = vld [vmem:[#allocation5] sm:$0xff] }
 0x122   : > { %4002 = vmatprep.subr.bf16.mxu1 %v4947_v35 }
 0x199   : > { %v713_v36 = vpop.xlane.xlu0 %712 }
 0x19a   : > { %v714_v37 = vmul.f32 0.03125, %v713_v36 }
 0x19c   : > { %v715_v38 = vadd.f32 1.1920929e-07, %v714_v37 }
 0x19e   : > { %4574 = vrsqrt.f32 %v715_v38 }
 0x1a8   : > { %v4575_v39 = vpop.eup %4574 }
 0x1a9   : > { %v717_v41 = vmul.f32 %v4575_v39, %v5311_v0  ;;  %v5475_v0 = vld [vmem:[#allocation2] sm:$0xff] }
 0x1ab   : > { %v725_v42 = vmul.f32 %v3604_v40, %v717_v41 }
 0x1ad   : > { %v726_v44 = vpack.c.bf16 %v725_v42, %v725_v42 }
 0x1af   : > { %1043 = vmatmul.mubr.bf16.vlgmr.msra.gmra.mrb[0].mxu0 %v726_v44  ;;  %1084 = vmatmul.mubr.bf16.vlgmr.msra.gmra.mrb[0].mxu1 %v726_v44 }
 0x1b0   : > { %3983 = vmatpush3.bf16.msra.mxu0 %v4414_v43  ;;  %3998 = vmatprep.mubr.msk.bf16.mxu0 %vm4948_vm0, %v4947_v35 }
 0x1b1   : > { %3984 = vmatprep.subr.bf16.mxu0 %v4947_v35  ;;  %4004 = vmatprep.mubr.msk.bf16.mxu1 %vm4948_vm0, %v4947_v35 }
 0x1b4   : > { %3985 = vmatpush3.bf16.msra.mxu0 %v4415_v45 }
 0x1b5   : > { %3986 = vmatprep.subr.bf16.mxu0 %v4947_v35 }
 0x1b8   : > { %3987 = vmatpush3.bf16.msra.mxu0 %v4416_v46 }
 0x1b9   : > { %3988 = vmatprep.subr.bf16.mxu0 %v4947_v35 }
 0x1bc   : > { %3989 = vmatpush3.bf16.msra.mxu0 %v4417_v47 }
 0x1bd   : > { %3990 = vmatprep.subr.bf16.mxu0 %v4947_v35 }
 0x1c0   : > { %3991 = vmatpush3.bf16.msra.mxu0 %v4418_v48 }
 0x1c1   : > { %3992 = vmatprep.subr.bf16.mxu0 %v4947_v35 }
 0x1c4   : > { %3993 = vmatpush3.bf16.msra.mxu0 %v4419_v49 }
 0x1c5   : > { %3994 = vmatprep.subr.bf16.mxu0 %v4947_v35 }
 0x1c8   : > { %3995 = vmatpush3.bf16.msra.mxu0 %v4420_v50  ;;  %v5520_v50 = vrot.slane %v5491_v20, %v5482_v10 }
 0x1c9   : > { %3996 = vmatprep.subr.bf16.mxu0 %v4947_v35 }
 0x1cc   : > { %3997 = vmatpush3.bf16.msra.mxu0 %v4421_v51 }
 0x1cd   : > { %4050 = vmatprep.subr.bf16.mxu0 %v4947_v35 }
 0x1cf   : > { %3999 = vmatmul.mubr.bf16.vlgmr.msra.gmra.mrb[4].mxu0 %v726_v44 }
 0x1d0   : > { %4066 = vmatprep.mubr.msk.bf16.mxu0 %vm4948_vm0, %v4947_v35 }
 0x282   : > { %v1044_v60 = vpop.f32.mrb[0].mxu0  ;;  %v1085_v61 = vpop.f32.mrb[0].mxu1 }
 0x283   : > { %v1045_v62 = vadd.f32 %v1044_v60, %v780_v57  ;;  %v1046_v63 = vpop.f32.mrb[1].mxu0  ;;  %v1087_v1 = vpop.f32.mrb[1].mxu1  ;;  %v1086_v28 = vadd.f32 %v1085_v61, %v788_v24 }
 0x284   : > { %v1088_v2 = vadd.f32 %v1087_v1, %v792_v58  ;;  %v1048_v3 = vpop.f32.mrb[2].mxu0  ;;  %v1089_v4 = vpop.f32.mrb[2].mxu1  ;;  %v1047_v14 = vadd.f32 %v1046_v63, %v784_v12 }
 0x285   : > { %v1132_v5 = vmul.f32 %v1045_v62, %v5473_v59  ;;  %v1049_v6 = vpop.f32.mrb[3].mxu0  ;;  %v1090_v7 = vpop.f32.mrb[3].mxu1  ;;  %v1139_v30 = vpack.c.bf16 %v1086_v28, %v1086_v28 }
 0x286   : > { %v1133_v8 = vmul.f32 %v1088_v2, %v5475_v0  ;;  %v1135_v21 = vmul.f32 %v1047_v14, %v5473_v59 }
 0x287   : > { %v5507_v33 = vsel %vm1202_vm1, %v1139_v30, 0 }
 0x288   : > { %v5479_v9 = vadd.f32 %v1133_v8, %v1132_v5 }
 0x28a   : > { %v1144_v29 = vmul.f32 %v5498_v26, %v5479_v9  ;;  %v1251_v52 = vmul.f32 %v5520_v50, %v5479_v9 }
 0x28c   : > { %v1145_v31 = vpack.c.bf16 %v1144_v29, %v1144_v29  ;;  %v1252_v55 = vpack.c.bf16 %v1251_v52, %v1251_v52 }
 0x2a2   : > { %v1126_v16 = vpop.f32.mrb[4].mxu0 }
 0x2a3   : > { %v1127_v17 = vadd.f32 %v1126_v16, %v796_v13  ;;  %v4000_v18 = vpop.f32.mrb[5].mxu0 }
 0x2a4   : > { %v1129_v19 = vpop.f32.mrb[6].mxu0 }
 0x2a5   : > { %v1136_v22 = vmul.f32 %v1127_v17, %v5475_v0  ;;  %v4001_v23 = vpop.f32.mrb[7].mxu0  ;;  %v5538_v17 = vrot.slane %v5491_v20, %v5489_v15 }
 0x2a7   : > { %v1137_v25 = vadd.f32 %v1136_v22, %v1135_v21  ;;  %v1354_v19 = vmul.f32 %v5538_v17, %v5479_v9 }
 0x2a9   : > { %v5500_v27 = vpack.c.bf16 %v1137_v25, %v1137_v25  ;;  %v1355_v21 = vpack.c.bf16 %v1354_v19, %v1354_v19 }
 0x2ab   : > { %4003 = vmatpush3.bf16.xpose.msra.mxu1 %v5500_v27 }
 0x2ac   : > { %4008 = vmatprep.subr.bf16.mxu1 %v4947_v35 }
 0x2b2   : > { %4005 = vmatmul.mubr.bf16.vlgmr.msra.gmra.mrb[4].mxu1 %v1145_v31 }
 0x2b3   : > { %4009 = vmatpush3.bf16.msra.mxu1 %v5507_v33  ;;  %4010 = vmatprep.mubr.msk.bf16.mxu1 %vm4948_vm0, %v4947_v35 }
 0x2b4   : > { %4014 = vmatprep.subr.bf16.mxu1 %v4947_v35 }
 0x385   : > { %v1180_v36 = vpop.f32.mrb[4].mxu1 }
 0x386   : > { %v1181_v37 = vadd.f32 %v1180_v36, %v5513_v34  ;;  %v4006_v38 = vpop.f32.mrb[5].mxu1 }
 0x387   : > { %v1183_v39 = vpop.f32.mrb[6].mxu1 }
 0x388   : > { %v4007_v40 = vpop.f32.mrb[7].mxu1  ;;  %v1187_v41 = vsel %vm1186_vm2, %v1181_v37, -inf }
 0x389   : > { %1188 = vmax.xlane.f32.xlu0 %v1187_v41 }
 0x416   : > { %v1189_v42 = vpop.xlane.xlu0 %1188 }
 0x417   : > { %v1190_v43 = vsub.f32 %v1181_v37, %v1189_v42 }
 0x419   : > { %v1191_v44 = vmul.f32 1.442695, %v1190_v43 }
 0x41b   : > { %4576 = vpow2.f32 %v1191_v44 }
 0x425   : > { %v4577_v45 = vpop.eup %4576 }
 0x426   : > { %v1193_v46 = vsel %vm1186_vm2, %v4577_v45, 0.0 }
 0x427   : > { %1194 = vadd.xlane.f32.xlu1 %v1193_v46 }
 0x4b4   : > { %v1195_v47 = vpop.xlane.xlu1 %1194 }
 0x4b5   : > { %4578 = vrcp.f32 %v1195_v47 }
 0x4bf   : > { %v4579_v48 = vpop.eup %4578 }
 0x4c0   : > { %v1197_v49 = vmul.f32 %v4579_v48, %v4577_v45 }
 0x4c2   : > { %v1198_v51 = vpack.c.bf16 %v1197_v49, %v1197_v49  ;;  %v5558_v49 = vrot.slane %v5491_v20, %v5466_v56 }
 0x4c4   : > { %4011 = vmatmul.mubr.msk.bf16.vlgmr.msra.gmra.mrb[8].mxu1 %vm1186_vm2, %v1198_v51  ;;  %v1457_v52 = vmul.f32 %v5558_v49, %v5479_v9 }
 0x4c5   : > { %4015 = vmatpush3.bf16.xpose.msra.mxu1 %v5500_v27  ;;  %4016 = vmatprep.mubr.msk.bf16.mxu1 %vm4948_vm0, %v4947_v35 }
 0x4c6   : > { %4020 = vmatprep.subr.bf16.mxu1 %v4947_v35 }
 0x4cc   : > { %4017 = vmatmul.mubr.bf16.vlgmr.msra.gmra.mrb[12].mxu1 %v1252_v55  ;;  %v1458_v55 = vpack.c.bf16 %v1457_v52, %v1457_v52 }
 0x4cd   : > { %4021 = vmatpush3.bf16.msra.mxu1 %v5507_v33  ;;  %4022 = vmatprep.mubr.msk.bf16.mxu1 %vm4948_vm0, %v4947_v35 }
 0x4ce   : > { %4026 = vmatprep.subr.bf16.mxu1 %v4947_v35 }
 0x597   : > { %v1240_v57 = vpop.f32.mrb[8].mxu1 }
 0x598   : > { %v4012_v58 = vpop.f32.mrb[9].mxu1  ;;  %v1246_v23 = vmul.f32 %v1240_v57, %v5498_v26 }
 0x599   : > { %v1243_v60 = vpop.f32.mrb[10].mxu1 }
 0x59a   : > { %v4013_v61 = vpop.f32.mrb[11].mxu1 }
 0x59f   : > { %v1287_v62 = vpop.f32.mrb[12].mxu1 }
 0x5a0   : > { %v1288_v63 = vadd.f32 %v1287_v62, %v5513_v34  ;;  %v4018_v1 = vpop.f32.mrb[13].mxu1 }
 0x5a1   : > { %v1290_v2 = vpop.f32.mrb[14].mxu1 }
 0x5a2   : > { %v4019_v3 = vpop.f32.mrb[15].mxu1  ;;  %v1293_v4 = vsel %vm1186_vm2, %v1288_v63, -inf }
 0x5a3   : > { %1294 = vmax.xlane.f32.xlu1 %v1293_v4 }
 0x630   : > { %v1295_v5 = vpop.xlane.xlu1 %1294 }
 0x631   : > { %v1296_v6 = vsub.f32 %v1288_v63, %v1295_v5 }
 0x633   : > { %v1297_v7 = vmul.f32 1.442695, %v1296_v6 }
 0x635   : > { %4580 = vpow2.f32 %v1297_v7 }
 0x63f   : > { %v4581_v8 = vpop.eup %4580 }
 0x640   : > { %v1299_v12 = vsel %vm1186_vm2, %v4581_v8, 0.0 }
 0x641   : > { %1300 = vadd.xlane.f32.xlu0 %v1299_v12  ;;  %v4423_v12 = vld [vmem:[%s6030_s9 + $0x8] sm:$0xff]  }
 0x6ce   : > { %v1301_v13 = vpop.xlane.xlu0 %1300 }
 0x6cf   : > { %4582 = vrcp.f32 %v1301_v13  ;;  %v4424_v13 = vld [vmem:[%s6030_s9 + $0x10] sm:$0xff]  }
 0x6d9   : > { %v4583_v14 = vpop.eup %4582 }
 0x6da   : > { %v1303_v16 = vmul.f32 %v4583_v14, %v4581_v8  ;;  %v4422_v8 = vld [vmem:[%s6030_s9] sm:$0xff]   ;;  %v4425_v14 = vld [vmem:[%s6030_s9 + $0x18] sm:$0xff]  }
 0x6db   : > { %4051 = vmatpush3.bf16.msra.mxu0 %v4422_v8  ;;  %v4443_v8 = vld [vmem:[#allocation10 + $0x28] sm:$0xff]  }
 0x6dc   : > { %v1304_v18 = vpack.c.bf16 %v1303_v16, %v1303_v16  ;;  %4052 = vmatprep.subr.bf16.mxu0 %v4947_v35  ;;  %v4426_v16 = vld [vmem:[%s6030_s9 + $0x20] sm:$0xff]  }
 0x6de   : > { %4023 = vmatmul.mubr.msk.bf16.vlgmr.msra.gmra.mrb[16].mxu1 %vm1186_vm2, %v1304_v18  ;;  %v4427_v18 = vld [vmem:[%s6030_s9 + $0x28] sm:$0xff]  }
 0x6df   : > { %4027 = vmatpush3.bf16.xpose.msra.mxu1 %v5500_v27  ;;  %4028 = vmatprep.mubr.msk.bf16.mxu1 %vm4948_vm0, %v4947_v35 }
 0x6e0   : > { %4032 = vmatprep.subr.bf16.mxu1 %v4947_v35  ;;  %4053 = vmatpush3.bf16.msra.mxu0 %v4423_v12  ;;  %v4444_v12 = vld [vmem:[#allocation10 + $0x30] sm:$0xff]  }
 0x6e1   : > { %4054 = vmatprep.subr.bf16.mxu0 %v4947_v35 }
 0x6e4   : > { %4055 = vmatpush3.bf16.msra.mxu0 %v4424_v13  ;;  %v4445_v13 = vld [vmem:[#allocation10 + $0x38] sm:$0xff]  }
 0x6e5   : > { %4056 = vmatprep.subr.bf16.mxu0 %v4947_v35 }
 0x6e6   : > { %4029 = vmatmul.mubr.bf16.vlgmr.msra.gmra.mrb[20].mxu1 %v1355_v21 }
 0x6e7   : > { %4033 = vmatpush3.bf16.msra.mxu1 %v5507_v33  ;;  %4034 = vmatprep.mubr.msk.bf16.mxu1 %vm4948_vm0, %v4947_v35 }
 0x6e8   : > { %4038 = vmatprep.subr.bf16.mxu1 %v4947_v35  ;;  %4057 = vmatpush3.bf16.msra.mxu0 %v4425_v14  ;;  %v3659_v14 = vld [vmem:[%s6034_s13] ss:$0 sm:$0xff] }
 0x6e9   : > { %4058 = vmatprep.subr.bf16.mxu0 %v4947_v35 }
 0x6ec   : > { %4059 = vmatpush3.bf16.msra.mxu0 %v4426_v16 }
 0x6ed   : > { %4060 = vmatprep.subr.bf16.mxu0 %v4947_v35 }
 0x6f0   : > { %4061 = vmatpush3.bf16.msra.mxu0 %v4427_v18 }
 0x6f1   : > { %4062 = vmatprep.subr.bf16.mxu0 %v4947_v35 }
 0x7b1   : > { %v1342_v22 = vpop.f32.mrb[16].mxu1 }
 0x7b2   : > { %v1348_v24 = vmul.f32 %v1342_v22, %v5520_v50  ;;  %v4024_v25 = vpop.f32.mrb[17].mxu1 }
 0x7b3   : > { %v1345_v28 = vpop.f32.mrb[18].mxu1  ;;  %v4429_v25 = vld [vmem:[%s6030_s9 + $0x38] sm:$0xff]  }
 0x7b4   : > { %v1349_v29 = vadd.f32 %v1348_v24, %v1246_v23  ;;  %v4025_v30 = vpop.f32.mrb[19].mxu1  ;;  %v4428_v24 = vld [vmem:[%s6030_s9 + $0x30] sm:$0xff]  }
 0x7b5   : > { %4063 = vmatpush3.bf16.msra.mxu0 %v4428_v24 }
 0x7b6   : > { %4064 = vmatprep.subr.bf16.mxu0 %v4947_v35 }
 0x7b9   : > { %v1390_v31 = vpop.f32.mrb[20].mxu1  ;;  %4065 = vmatpush3.bf16.msra.mxu0 %v4429_v25 }
 0x7ba   : > { %v1391_v36 = vadd.f32 %v1390_v31, %v5513_v34  ;;  %v4030_v37 = vpop.f32.mrb[21].mxu1  ;;  %4090 = vmatprep.subr.bf16.mxu0 %v4947_v35 }
 0x7bb   : > { %v1393_v38 = vpop.f32.mrb[22].mxu1 }
 0x7bc   : > { %v4031_v39 = vpop.f32.mrb[23].mxu1  ;;  %v1396_v40 = vsel %vm1186_vm2, %v1391_v36, -inf }
 0x7bd   : > { %1397 = vmax.xlane.f32.xlu1 %v1396_v40  ;;  %v4430_v39 = vld [vmem:[%s6033_s12] sm:$0xff]   ;;  %v4431_v40 = vld [vmem:[%s6033_s12 + $0x8] sm:$0xff]  }
 0x84a   : > { %v1398_v41 = vpop.xlane.xlu1 %1397 }
 0x84b   : > { %v1399_v42 = vsub.f32 %v1391_v36, %v1398_v41  ;;  %v4432_v41 = vld [vmem:[%s6033_s12 + $0x10] sm:$0xff]  }
 0x84d   : > { %v1400_v43 = vmul.f32 1.442695, %v1399_v42  ;;  %v3649_v42 = vld [vmem:[%s6031_s10] ss:$0 sm:$0xff] }
 0x84f   : > { %4584 = vpow2.f32 %v1400_v43 }
 0x859   : > { %v4585_v44 = vpop.eup %4584 }
 0x85a   : > { %v1402_v45 = vsel %vm1186_vm2, %v4585_v44, 0.0 }
 0x85b   : > { %1403 = vadd.xlane.f32.xlu0 %v1402_v45 }
 0x8e8   : > { %v1404_v46 = vpop.xlane.xlu0 %1403 }
 0x8e9   : > { %4586 = vrcp.f32 %v1404_v46 }
 0x8f3   : > { %v4587_v47 = vpop.eup %4586 }
 0x8f4   : > { %v1406_v48 = vmul.f32 %v4587_v47, %v4585_v44  ;;  %v4624_v47 = vld [vmem:[%s5308_s11] sm:$0xff]  ;;  %s698_s11 = sand.u32 1, %s6099_s2  }
 0x8f5   : > { %s3602_s23 = sshll.u32 %s698_s11, 5  ;;  %s3430_s1 = scalar_lea.sflag [#allocation4], %s698_s11 }
 0x8f6   : > { %v1407_v51 = vpack.c.bf16 %v1406_v48, %v1406_v48  ;;  %s700_s28 = scalar_lea.vmem [#allocation16], %s3602_s23 }
 0x8f7   : > { %s3444_s20 = sshll.u32 %s700_s28, 4  ;;  %s5976_s20 = int_to_ptr.vmem [resolvable:$true] %s3444_s20 }
 0x8f8   : > { %4035 = vmatmul.mubr.msk.bf16.vlgmr.msra.gmra.mrb[24].mxu1 %vm1186_vm2, %v1407_v51  ;;  %s4849_s24 = scalar_lea.vmem %s5976_s20, 512  ;;  %p4856_p1 = scmp.lt.s32.totalorder %s5976_s20, %s4854_s25 }
 0x8f9   : > { %4039 = vmatpush3.bf16.xpose.msra.mxu1 %v5500_v27  ;;  %4040 = vmatprep.mubr.msk.bf16.mxu1 %vm4948_vm0, %v4947_v35  ;;  %p4850_p8 = scmp.ne.s32.totalorder %s5976_s20, %s4849_s24  ;;  %p4857_p6 = scmp.lt.s32.totalorder %s4855_s30, %s4849_s24 }
 0x8fa   : > { %4044 = vmatprep.subr.bf16.mxu1 %v4947_v35 }
 0x8fb   : > { %p4851_p13 = pnand %p4850_p8, %p6102_p11  ;;  %p4858_p5 = por %p4857_p6, %p4856_p1 }
 0x8fd   : > { %p4852_p0 = pneg %p4851_p13 }
 0x8ff   : > { %p4859_p9 = pnand %p4858_p5, %p4852_p0 }
 0x900   : > { %4041 = vmatmul.mubr.bf16.vlgmr.msra.gmra.mrb[28].mxu1 %v1458_v55  ;;  %v4433_v55 = vld [vmem:[%s6033_s12 + $0x18] sm:$0xff]  }
 0x901   : > { %4045 = vmatpush3.bf16.msra.mxu1 %v5507_v33  ;;  %4046 = vmatprep.mubr.msk.bf16.mxu1 %vm4948_vm0, %v4947_v35 }
 0x902   : > { %4070 = vmatprep.subr.bf16.mxu1 %v4947_v35 }
 0x9cb   : > { %v1445_v20 = vpop.f32.mrb[24].mxu1 }
 0x9cc   : > { %v1451_v27 = vmul.f32 %v1445_v20, %v5538_v17  ;;  %v4036_v57 = vpop.f32.mrb[25].mxu1  ;;  %v4434_v20 = vld [vmem:[%s6033_s12 + $0x20] sm:$0xff]  }
 0x9cd   : > { %v1448_v58 = vpop.f32.mrb[26].mxu1  ;;  %v4436_v57 = vld [vmem:[%s6033_s12 + $0x30] sm:$0xff]  }
 0x9ce   : > { %v1452_v60 = vadd.f32 %v1451_v27, %v1349_v29  ;;  %v4037_v61 = vpop.f32.mrb[27].mxu1  ;;  %v4435_v27 = vld [vmem:[%s6033_s12 + $0x28] sm:$0xff]   ;;  %v4437_v58 = vld [vmem:[%s6033_s12 + $0x38] sm:$0xff]  }
 0x9d3   : > { %v1493_v62 = vpop.f32.mrb[28].mxu1 }
 0x9d4   : > { %v1494_v63 = vadd.f32 %v1493_v62, %v5513_v34  ;;  %v4042_v9 = vpop.f32.mrb[29].mxu1 }
 0x9d5   : > { %v1496_v1 = vpop.f32.mrb[30].mxu1  ;;  %v3658_v9 = vld [vmem:[#allocation8] ss:$0 sm:$0xff] }
 0x9d6   : > { %v4043_v2 = vpop.f32.mrb[31].mxu1  ;;  %v1499_v33 = vsel %vm1186_vm2, %v1494_v63, -inf }
 0x9d7   : > { %1500 = vmax.xlane.f32.xlu1 %v1499_v33 }
 0xa64   : > { %v1501_v3 = vpop.xlane.xlu1 %1500 }
 0xa65   : > { %v1502_v4 = vsub.f32 %v1494_v63, %v1501_v3  ;;  %v4438_v3 = vld [vmem:[#allocation10] sm:$0xff]  }
 0xa67   : > { %v1503_v5 = vmul.f32 1.442695, %v1502_v4  ;;  %v4439_v4 = vld [vmem:[#allocation10 + $0x8] sm:$0xff]  }
 0xa69   : > { %4588 = vpow2.f32 %v1503_v5  ;;  %v4440_v5 = vld [vmem:[#allocation10 + $0x10] sm:$0xff]  }
 0xa73   : > { %v4589_v6 = vpop.eup %4588 }
 0xa74   : > { %v1505_v7 = vsel %vm1186_vm2, %v4589_v6, 0.0 }
 0xa75   : > { %1506 = vadd.xlane.f32.xlu0 %v1505_v7  ;;  %v4442_v7 = vld [vmem:[#allocation10 + $0x20] sm:$0xff]  }
 0xb02   : > { %v1507_v19 = vpop.xlane.xlu0 %1506 }
 0xb03   : > { %4590 = vrcp.f32 %v1507_v19 }
 0xb0d   : > { %v4591_v21 = vpop.eup %4590 }
 0xb0e   : > { %v1509_v22 = vmul.f32 %v4591_v21, %v4589_v6  ;;  %v4441_v6 = vld [vmem:[#allocation10 + $0x18] sm:$0xff]  }
 0xb10   : > { %v1510_v23 = vpack.c.bf16 %v1509_v22, %v1509_v22 }
 0xb12   : > { %4047 = vmatmul.mubr.msk.bf16.vlgmr.msra.gmra.mrb[32].mxu1 %vm1186_vm2, %v1510_v23 }
 0xb13   : > { %4086 = vmatprep.mubr.msk.bf16.mxu1 %vm4948_vm0, %v4947_v35  ;;  %4071 = vmatpush3.bf16.msra.mxu1 %v4430_v39  ;;  %v4454_v39 = vld [vmem:[%s6028_s7 + $0x16c] ss:$20 sps:$4 sm:$0xff]  }
 0xb14   : > { %4072 = vmatprep.subr.bf16.mxu1 %v4947_v35 }
 0xb17   : > { %4073 = vmatpush3.bf16.msra.mxu1 %v4431_v40  ;;  %v4457_v40 = vld [vmem:[%s6028_s7 + $0x174] ss:$20 sps:$4 sm:$0xff]  }
 0xb18   : > { %4074 = vmatprep.subr.bf16.mxu1 %v4947_v35 }
 0xb1b   : > { %4075 = vmatpush3.bf16.msra.mxu1 %v4432_v41  ;;  %v4452_v41 = vld [vmem:[%s6028_s7 + $0x168] ss:$20 sps:$4 sm:$0xff]  }
 0xb1c   : > { %4076 = vmatprep.subr.bf16.mxu1 %v4947_v35 }
 0xb1f   : > { %4077 = vmatpush3.bf16.msra.mxu1 %v4433_v55 }
 0xb20   : > { %4078 = vmatprep.subr.bf16.mxu1 %v4947_v35 }
 0xb23   : > { %4079 = vmatpush3.bf16.msra.mxu1 %v4434_v20 }
 0xb24   : > { %4080 = vmatprep.subr.bf16.mxu1 %v4947_v35 }
 0xb27   : > { %4081 = vmatpush3.bf16.msra.mxu1 %v4435_v27 }
 0xb28   : > { %4082 = vmatprep.subr.bf16.mxu1 %v4947_v35 }
 0xb2b   : > { %4083 = vmatpush3.bf16.msra.mxu1 %v4436_v57 }
 0xb2c   : > { %4084 = vmatprep.subr.bf16.mxu1 %v4947_v35 }
 0xb2f   : > { %4085 = vmatpush3.bf16.msra.mxu1 %v4437_v58 }
 0xbe5   : > { %v1548_v28 = vpop.f32.mrb[32].mxu1 }
 0xbe6   : > { %v1554_v29 = vmul.f32 %v1548_v28, %v5558_v49  ;;  %v4048_v30 = vpop.f32.mrb[33].mxu1 }
 0xbe7   : > { %v1551_v31 = vpop.f32.mrb[34].mxu1 }
 0xbe8   : > { %v1555_v36 = vadd.f32 %v1554_v29, %v1452_v60  ;;  %v4049_v37 = vpop.f32.mrb[35].mxu1  ;;  %v4446_v31 = vld [vmem:[%s6028_s7 + $0x140] ss:$20 sps:$4 sm:$0xff]  }
 0xbe9   : > { %v4449_v37 = vld [vmem:[%s6028_s7 + $0x148] ss:$20 sps:$4 sm:$0xff]  }
 0xbea   : > { %v1556_v38 = vpack.c.bf16 %v1555_v36, %v1555_v36  ;;  %v4448_v36 = vld [vmem:[%s6028_s7 + $0x144] ss:$20 sps:$4 sm:$0xff]  }
 0xbeb   : > { %2219 = vmatprep.subr.bf16.mxu1 %v4448_v36  ;;  %v4496_v36 = vld [vmem:[%s6028_s7 + $0x1a0] ss:$20 sps:$4 sm:$0xff]  }
 0xbec   : > { %4067 = vmatmul.mubr.bf16.vlgmr.msra.gmra.mrb[8].mxu0 %v1556_v38  ;;  %v4451_v38 = vld [vmem:[%s6028_s7 + $0x14c] ss:$20 sps:$4 sm:$0xff]  }
 0xbed   : > { %4106 = vmatprep.mubr.msk.bf16.mxu0 %vm4948_vm0, %v4947_v35  ;;  %4091 = vmatpush3.bf16.msra.mxu0 %v4438_v3  ;;  %v4476_v3 = vld [vmem:[%s6028_s7 + $0x208] ss:$20 sps:$4 sm:$0xff]  }
 0xbee   : > { %4092 = vmatprep.subr.bf16.mxu0 %v4947_v35 }
 0xbf1   : > { %4093 = vmatpush3.bf16.msra.mxu0 %v4439_v4  ;;  %v4481_v4 = vld [vmem:[%s6028_s7 + $0x214] ss:$20 sps:$4 sm:$0xff]  }
 0xbf2   : > { %4094 = vmatprep.subr.bf16.mxu0 %v4947_v35 }
 0xbf5   : > { %4095 = vmatpush3.bf16.msra.mxu0 %v4440_v5  ;;  %v4479_v5 = vld [vmem:[%s6028_s7 + $0x210] ss:$20 sps:$4 sm:$0xff]  }
 0xbf6   : > { %4096 = vmatprep.subr.bf16.mxu0 %v4947_v35 }
 0xbf9   : > { %4097 = vmatpush3.bf16.msra.mxu0 %v4441_v6  ;;  %v4484_v6 = vld [vmem:[%s6028_s7 + $0x234] ss:$20 sps:$4 sm:$0xff]  }
 0xbfa   : > { %4098 = vmatprep.subr.bf16.mxu0 %v4947_v35 }
 0xbfd   : > { %4099 = vmatpush3.bf16.msra.mxu0 %v4442_v7  ;;  %v4487_v7 = vld [vmem:[%s6028_s7 + $0x23c] ss:$20 sps:$4 sm:$0xff]  }
 0xbfe   : > { %4100 = vmatprep.subr.bf16.mxu0 %v4947_v35 }
 0xc01   : > { %4101 = vmatpush3.bf16.msra.mxu0 %v4443_v8  ;;  %v4482_v8 = vld [vmem:[%s6028_s7 + $0x230] ss:$20 sps:$4 sm:$0xff]  }
 0xc02   : > { %4102 = vmatprep.subr.bf16.mxu0 %v4947_v35 }
 0xc05   : > { %4103 = vmatpush3.bf16.msra.mxu0 %v4444_v12  ;;  %v4485_v12 = vld [vmem:[%s6028_s7 + $0x238] ss:$20 sps:$4 sm:$0xff]  }
 0xc06   : > { %4104 = vmatprep.subr.bf16.mxu0 %v4947_v35 }
 0xc09   : > { %4105 = vmatpush3.bf16.msra.mxu0 %v4445_v13  ;;  %v4490_v13 = vld [vmem:[%s6028_s7 + $0x25c] ss:$20 sps:$4 sm:$0xff]  }
 0xc0a   : > { %2260 = vmatprep.subr.bf16.mxu0 %v4451_v38  ;;  %v4498_v38 = vld [vmem:[%s6028_s7 + $0x1f0] ss:$20 sps:$4 sm:$0xff]  }
 0xcbf   : > { %v1662_v43 = vpop.f32.mrb[8].mxu0 }
 0xcc0   : > { %v1663_v44 = vadd.f32 %v3649_v42, %v1662_v43  ;;  %v4068_v45 = vpop.f32.mrb[9].mxu0  ;;  %v4455_v42 = vld [vmem:[%s6028_s7 + $0x170] ss:$20 sps:$4 sm:$0xff]   ;;  %v4460_v43 = vld [vmem:[%s6028_s7 + $0x194] ss:$20 sps:$4 sm:$0xff]  }
 0xcc1   : > { %v1665_v46 = vpop.f32.mrb[10].mxu0  ;;  %v4458_v45 = vld [vmem:[%s6028_s7 + $0x190] ss:$20 sps:$4 sm:$0xff]  }
 0xcc2   : > { %v5629_v48 = vadd.f32 %v4624_v47, %v1663_v44  ;;  %v4069_v51 = vpop.f32.mrb[11].mxu0  ;;  %v4463_v44 = vld [vmem:[%s6028_s7 + $0x19c] ss:$20 sps:$4 sm:$0xff]   ;;  %v4461_v46 = vld [vmem:[%s6028_s7 + $0x198] ss:$20 sps:$4 sm:$0xff]  }
 0xcc3   : > { %v3677_v51 = vld [vmem:[%s6036_s15] ss:$0 sm:$0xff] }
 0xcc4   : > { %v1669_v52 = vmul.f32 %v5629_v48, %v5629_v48 }
 0xcc6   : > { %1670 = vadd.xlane.f32.xlu1 %v1669_v52 }
 0xd53   : > { %v1671_v60 = vpop.xlane.xlu1 %1670 }
 0xd54   : > { %v1672_v61 = vmul.f32 0.03125, %v1671_v60  ;;  %v4466_v60 = vld [vmem:[%s6028_s7 + $0x1bc] ss:$20 sps:$4 sm:$0xff]  }
 0xd56   : > { %v1673_v62 = vadd.f32 1.1920929e-07, %v1672_v61  ;;  %v4464_v61 = vld [vmem:[%s6028_s7 + $0x1b8] ss:$20 sps:$4 sm:$0xff]  }
 0xd58   : > { %4592 = vrsqrt.f32 %v1673_v62  ;;  %v4467_v62 = vld [vmem:[%s6028_s7 + $0x1c0] ss:$20 sps:$4 sm:$0xff]  }
 0xd62   : > { %v4593_v63 = vpop.eup %4592 }
 0xd63   : > { %v1675_v1 = vmul.f32 %v4593_v63, %v5629_v48  ;;  %v4472_v63 = vld [vmem:[%s6028_s7 + $0x1e4] ss:$20 sps:$4 sm:$0xff]  }
 0xd65   : > { %v1683_v2 = vmul.f32 %v3658_v9, %v1675_v1  ;;  %v4470_v9 = vld [vmem:[%s6028_s7 + $0x1e0] ss:$20 sps:$4 sm:$0xff]   ;;  %v4473_v1 = vld [vmem:[%s6028_s7 + $0x1e8] ss:$20 sps:$4 sm:$0xff]  }
 0xd67   : > { %v1684_v33 = vpack.c.bf16 %v1683_v2, %v1683_v2  ;;  %v4475_v2 = vld [vmem:[%s6028_s7 + $0x1ec] ss:$20 sps:$4 sm:$0xff]  }
 0xd69   : > { %4087 = vmatmul.mubr.bf16.vlgmr.msra.gmra.mrb[36].mxu1 %v1684_v33  ;;  %v4478_v33 = vld [vmem:[%s6028_s7 + $0x20c] ss:$20 sps:$4 sm:$0xff]  }
 0xd6a   : > { %2251 = vmatprep.mubr.bf16.mxu1 %v4946_v32  ;;  %2220 = vmatpush1.bf16.msra.mxu1 %v4446_v31  ;;  %v4495_v31 = vld [vmem:[%s6028_s7 + $0x178] ss:$20 sps:$4 sm:$0xff]  }
 0xd6b   : > { %2221 = vmatprep.subr.bf16.mxu1 %v4454_v39  ;;  %v4499_v39 = vld [vmem:[%s6028_s7 + $0x218] ss:$20 sps:$4 sm:$0xff]  }
 0xd6e   : > { %2222 = vmatpush1.bf16.msra.mxu1 %v4452_v41  ;;  %v4501_v41 = vld [vmem:[%s6028_s7 + $0x268] ss:$20 sps:$4 sm:$0xff]  }
 0xd6f   : > { %2223 = vmatprep.subr.bf16.mxu1 %v4460_v43 }
 0xd72   : > { %2224 = vmatpush1.bf16.msra.mxu1 %v4458_v45 }
 0xd73   : > { %2225 = vmatprep.subr.bf16.mxu1 %v4466_v60 }
 0xd76   : > { %2226 = vmatpush1.bf16.msra.mxu1 %v4464_v61 }
 0xd77   : > { %2227 = vmatprep.subr.bf16.mxu1 %v4472_v63 }
 0xd7a   : > { %2228 = vmatpush1.bf16.msra.mxu1 %v4470_v9 }
 0xd7b   : > { %2229 = vmatprep.subr.bf16.mxu1 %v4478_v33 }
 0xd7e   : > { %2230 = vmatpush1.bf16.msra.mxu1 %v4476_v3 }
 0xd7f   : > { %2231 = vmatprep.subr.bf16.mxu1 %v4484_v6 }
 0xd82   : > { %2232 = vmatpush1.bf16.msra.mxu1 %v4482_v8 }
 0xd83   : > { %2233 = vmatprep.subr.bf16.mxu1 %v4490_v13 }
 0xe3c   : > { %v1790_v16 = vpop.f32.mrb[36].mxu1 }
 0xe3d   : > { %v1791_v18 = vadd.f32 %v3659_v14, %v1790_v16  ;;  %v4088_v19 = vpop.f32.mrb[37].mxu1  ;;  %v4493_v14 = vld [vmem:[%s6028_s7 + $0x264] ss:$20 sps:$4 sm:$0xff]  }
 0xe3e   : > { %v1793_v21 = vpop.f32.mrb[38].mxu1  ;;  %v4488_v16 = vld [vmem:[%s6028_s7 + $0x258] ss:$20 sps:$4 sm:$0xff]  }
 0xe3f   : > { %v3668_v22 = vmul.f32 -1.442695, %v1791_v18  ;;  %v4089_v23 = vpop.f32.mrb[39].mxu1  ;;  %2234 = vmatpush1.bf16.msra.mxu1 %v4488_v16 }
 0xe40   : > { %4110 = vmatprep.subr.bf16.mxu1 %v4947_v35 }
 0xe41   : > { %4594 = vpow2.f32 %v3668_v22 }
 0xe4b   : > { %v4595_v24 = vpop.eup %4594 }
 0xe4c   : > { %v1799_v25 = vadd.f32 1.0, %v4595_v24  ;;  %v3679_v24 = vld [vmem:[%s6027_s6 + $0x1] ss:$0 sm:$0xff] }
 0xe4e   : > { %4596 = vrcp.f32 %v1799_v25 }
 0xe58   : > { %v4597_v28 = vpop.eup %4596 }
 0xe59   : > { %v1802_v29 = vmul.f32 %v4597_v28, %v1791_v18  ;;  %v4491_v18 = vld [vmem:[%s6028_s7 + $0x260] ss:$20 sps:$4 sm:$0xff]  }
 0xe5b   : > { %v1803_v30 = vpack.c.bf16 %v1802_v29, %v1802_v29  ;;  %v4494_v29 = vld [vmem:[%s6028_s7 + $0x150] ss:$20 sps:$4 sm:$0xff]  }
 0xe5d   : > { %4107 = vmatmul.mubr.bf16.vlgmr.msra.gmra.mrb[12].mxu0 %v1803_v30 }
 0xe5e   : > { %2292 = vmatprep.mubr.bf16.mxu0 %v4946_v32  ;;  %2261 = vmatpush1.bf16.msra.mxu0 %v4449_v37  ;;  %v4497_v37 = vld [vmem:[%s6028_s7 + $0x1c8] ss:$20 sps:$4 sm:$0xff]  }
 0xe5f   : > { %2262 = vmatprep.subr.bf16.mxu0 %v4457_v40  ;;  %v4500_v40 = vld [vmem:[%s6028_s7 + $0x240] ss:$20 sps:$4 sm:$0xff]  }
 0xe62   : > { %2263 = vmatpush1.bf16.msra.mxu0 %v4455_v42  ;;  %v3728_v42 = vld [vmem:[%s6029_s8 + $0x5] sm:$0x1f] }
 0xe63   : > { %2264 = vmatprep.subr.bf16.mxu0 %v4463_v44  ;;  %v1989_v43 = vrot.slane %v3728_v42, %v5460_v54  ;;  %v1997_v44 = vrot.slane %v3728_v42, %v5489_v15  ;;  %v2001_v45 = vrot.slane %v3728_v42, %v5466_v56  ;;  %v1993_v9 = vrot.slane %v3728_v42, %v5482_v10 }
 0xe66   : > { %2265 = vmatpush1.bf16.msra.mxu0 %v4461_v46 }
 0xf30   : > { %v1902_v47 = vpop.f32.mrb[12].mxu0 }
 0xf31   : > { %v1908_v52 = vadd.f32 %v1902_v47, %v5629_v48  ;;  %v4108_v55 = vpop.f32.mrb[13].mxu0  ;;  %v4469_v48 = vld [vmem:[%s6028_s7 + $0x1c4] ss:$20 sps:$4 sm:$0xff]  }
 0xf32   : > { %v1905_v20 = vpop.f32.mrb[14].mxu0  ;;  %2266 = vmatprep.subr.bf16.mxu0 %v4469_v48 }
 0xf33   : > { %v5705_v27 = vadd.f32 %v3677_v51, %v1908_v52  ;;  %v4109_v57 = vpop.f32.mrb[15].mxu0  ;;  %2267 = vmatpush1.bf16.msra.mxu0 %v4467_v62 }
 0xf34   : > { %2268 = vmatprep.subr.bf16.mxu0 %v4475_v2 }
 0xf35   : > { %v1917_v58 = vmul.f32 %v5705_v27, %v5705_v27 }
 0xf37   : > { %1918 = vadd.xlane.f32.xlu0 %v1917_v58  ;;  %2269 = vmatpush1.bf16.msra.mxu0 %v4473_v1  ;;  %v2005_v1 = vrot.slane %v3728_v42, %v795_v11 }
 0xf38   : > { %2270 = vmatprep.subr.bf16.mxu0 %v4481_v4 }
 0xf3b   : > { %2271 = vmatpush1.bf16.msra.mxu0 %v4479_v5 }
 0xf3c   : > { %2272 = vmatprep.subr.bf16.mxu0 %v4487_v7 }
 0xf3f   : > { %2273 = vmatpush1.bf16.msra.mxu0 %v4485_v12 }
 0xf40   : > { %2274 = vmatprep.subr.bf16.mxu0 %v4493_v14 }
 0xf43   : > { %2275 = vmatpush1.bf16.msra.mxu0 %v4491_v18 }
 0xf44   : > { %4130 = vmatprep.subr.bf16.mxu0 %v4947_v35 }
 0xfc4   : > { %v1919_v19 = vpop.xlane.xlu0 %1918 }
 0xfc5   : > { %v1920_v21 = vmul.f32 0.03125, %v1919_v19 }
 0xfc7   : > { %v1921_v22 = vadd.f32 1.1920929e-07, %v1920_v21 }
 0xfc9   : > { %4598 = vrsqrt.f32 %v1921_v22 }
 0xfd3   : > { %v4599_v23 = vpop.eup %4598 }
 0xfd4   : > { %v1923_v25 = vmul.f32 %v4599_v23, %v5705_v27 }
 0xfd6   : > { %v1932_v28 = vmul.f32 %v3679_v24, %v1923_v25 }
 0xfd8   : > { %v1933_v30 = vpack.c.bf16 %v1932_v28, %v1932_v28 }
 0xfda   : > { %2252 = vmatmul.mubr.bf16.vlgmr.msra.gmra.mrb[40].mxu1 %v1933_v30  ;;  %2293 = vmatmul.mubr.bf16.vlgmr.msra.gmra.mrb[16].mxu0 %v1933_v30 }
 0xfdb   : > { %4111 = vmatpush3.bf16.msra.mxu1 %v4494_v29  ;;  %4126 = vmatprep.mubr.msk.bf16.mxu1 %vm4948_vm0, %v4947_v35 }
 0xfdc   : > { %4112 = vmatprep.subr.bf16.mxu1 %v4947_v35  ;;  %4132 = vmatprep.mubr.msk.bf16.mxu0 %vm4948_vm0, %v4947_v35 }
 0xfdf   : > { %4113 = vmatpush3.bf16.msra.mxu1 %v4495_v31 }
 0xfe0   : > { %4114 = vmatprep.subr.bf16.mxu1 %v4947_v35 }
 0xfe3   : > { %4115 = vmatpush3.bf16.msra.mxu1 %v4496_v36 }
 0xfe4   : > { %4116 = vmatprep.subr.bf16.mxu1 %v4947_v35 }
 0xfe7   : > { %4117 = vmatpush3.bf16.msra.mxu1 %v4497_v37 }
 0xfe8   : > { %4118 = vmatprep.subr.bf16.mxu1 %v4947_v35 }
 0xfeb   : > { %4119 = vmatpush3.bf16.msra.mxu1 %v4498_v38 }
 0xfec   : > { %4120 = vmatprep.subr.bf16.mxu1 %v4947_v35 }
 0xfef   : > { %4121 = vmatpush3.bf16.msra.mxu1 %v4499_v39 }
 0xff0   : > { %4122 = vmatprep.subr.bf16.mxu1 %v4947_v35 }
 0xff3   : > { %4123 = vmatpush3.bf16.msra.mxu1 %v4500_v40 }
 0xff4   : > { %4124 = vmatprep.subr.bf16.mxu1 %v4947_v35 }
 0xff7   : > { %4125 = vmatpush3.bf16.msra.mxu1 %v4501_v41 }
 0xff8   : > { %4136 = vmatprep.subr.bf16.mxu1 %v4947_v35 }
 0xffa   : > { %4127 = vmatmul.mubr.bf16.vlgmr.msra.gmra.mrb[44].mxu1 %v1933_v30 }
 0xffb   : > { %4138 = vmatprep.mubr.msk.bf16.mxu1 %vm4948_vm0, %v4947_v35 }
0x10ad   : > { %v2253_v46 = vpop.f32.mrb[40].mxu1  ;;  %v2294_v47 = vpop.f32.mrb[16].mxu0 }
0x10ae   : > { %v2254_v51 = vadd.f32 %v2253_v46, %v1989_v43  ;;  %v2295_v52 = vadd.f32 %v2294_v47, %v1997_v44  ;;  %v2255_v55 = vpop.f32.mrb[41].mxu1  ;;  %v2296_v20 = vpop.f32.mrb[17].mxu0 }
0x10af   : > { %v2297_v57 = vadd.f32 %v2296_v20, %v2001_v45  ;;  %v2257_v58 = vpop.f32.mrb[42].mxu1  ;;  %v2298_v60 = vpop.f32.mrb[18].mxu0  ;;  %v2256_v2 = vadd.f32 %v2255_v55, %v1993_v9 }
0x10b0   : > { %v2341_v61 = vmul.f32 %v2254_v51, %v5473_v59  ;;  %v2348_v48 = vpack.c.bf16 %v2295_v52, %v2295_v52  ;;  %v2258_v62 = vpop.f32.mrb[43].mxu1  ;;  %v2299_v63 = vpop.f32.mrb[19].mxu0 }
0x10b1   : > { %v2342_v54 = vmul.f32 %v2297_v57, %v5475_v0  ;;  %v2344_v6 = vmul.f32 %v2256_v2, %v5473_v59 }
0x10b2   : > { %v5822_v15 = vsel %vm1202_vm1, %v2348_v48, 0 }
0x10b3   : > { %v2343_v56 = vadd.f32 %v2342_v54, %v2341_v61  ;;  %4137 = vmatpush3.bf16.msra.mxu1 %v5822_v15 }
0x10b4   : > { %4148 = vmatprep.subr.bf16.mxu1 %v4947_v35 }
0x10b5   : > { %v2349_v14 = vmul.f32 %v2343_v56, %v5498_v26  ;;  %v2450_v53 = vmul.f32 %v2343_v56, %v5520_v50  ;;  %v2648_v16 = vmul.f32 %v2343_v56, %v5558_v49 }
0x10b7   : > { %v2350_v10 = vpack.c.bf16 %v2349_v14, %v2349_v14  ;;  %v2451_v59 = vpack.c.bf16 %v2450_v53, %v2450_v53  ;;  %v2649_v18 = vpack.c.bf16 %v2648_v16, %v2648_v16 }
0x10cd   : > { %v2335_v33 = vpop.f32.mrb[44].mxu1 }
0x10ce   : > { %v2336_v3 = vadd.f32 %v2335_v33, %v2005_v1  ;;  %v4128_v4 = vpop.f32.mrb[45].mxu1 }
0x10cf   : > { %v2338_v5 = vpop.f32.mrb[46].mxu1 }
0x10d0   : > { %v2345_v7 = vmul.f32 %v2336_v3, %v5475_v0  ;;  %v4129_v8 = vpop.f32.mrb[47].mxu1  ;;  %v2549_v0 = vmul.f32 %v2343_v56, %v5538_v17 }
0x10d2   : > { %v2346_v12 = vadd.f32 %v2345_v7, %v2344_v6  ;;  %v2550_v11 = vpack.c.bf16 %v2549_v0, %v2549_v0 }
0x10d4   : > { %v2347_v13 = vpack.c.bf16 %v2346_v12, %v2346_v12 }
0x10d6   : > { %4131 = vmatpush3.bf16.xpose.msra.mxu0 %v2347_v13 }
0x10d7   : > { %4142 = vmatprep.subr.bf16.mxu0 %v4947_v35 }
0x10dd   : > { %4133 = vmatmul.mubr.bf16.vlgmr.msra.gmra.mrb[20].mxu0 %v2350_v10 }
0x10de   : > { %4143 = vmatpush3.bf16.xpose.msra.mxu0 %v2347_v13  ;;  %4144 = vmatprep.mubr.msk.bf16.mxu0 %vm4948_vm0, %v4947_v35 }
0x10df   : > { %4154 = vmatprep.subr.bf16.mxu0 %v4947_v35 }
0x10e5   : > { %4145 = vmatmul.mubr.bf16.vlgmr.msra.gmra.mrb[24].mxu0 %v2451_v59 }
0x10e6   : > { %4155 = vmatpush3.bf16.xpose.msra.mxu0 %v2347_v13  ;;  %4156 = vmatprep.mubr.msk.bf16.mxu0 %vm4948_vm0, %v4947_v35 }
0x10e7   : > { %4166 = vmatprep.subr.bf16.mxu0 %v4947_v35 }
0x10ed   : > { %4157 = vmatmul.mubr.bf16.vlgmr.msra.gmra.mrb[28].mxu0 %v2550_v11 }
0x10ee   : > { %4167 = vmatpush3.bf16.xpose.msra.mxu0 %v2347_v13  ;;  %4168 = vmatprep.mubr.msk.bf16.mxu0 %vm4948_vm0, %v4947_v35 }
0x10ef   : > { %4178 = vmatprep.subr.bf16.mxu0 %v4947_v35 }
0x10f5   : > { %4169 = vmatmul.mubr.bf16.vlgmr.msra.gmra.mrb[32].mxu0 %v2649_v18 }
0x10f6   : > { %4194 = vmatprep.mubr.msk.bf16.mxu0 %vm4948_vm0, %v4947_v35 }
0x11b0   : > { %v2385_v19 = vpop.f32.mrb[20].mxu0 }
0x11b1   : > { %v2386_v21 = vadd.f32 %v2385_v19, %v5513_v34  ;;  %v4134_v22 = vpop.f32.mrb[21].mxu0 }
0x11b2   : > { %v2388_v23 = vpop.f32.mrb[22].mxu0 }
0x11b3   : > { %v4135_v24 = vpop.f32.mrb[23].mxu0  ;;  %v2391_v25 = vsel %vm1186_vm2, %v2386_v21, -inf }
0x11b4   : > { %2392 = vmax.xlane.f32.xlu1 %v2391_v25  ;;  %v4502_v24 = vld [vmem:[%s6030_s9 + $0x40] sm:$0xff]   ;;  %v4504_v25 = vld [vmem:[%s6030_s9 + $0x50] sm:$0xff]  }
0x11b5   : > { %4179 = vmatpush3.bf16.msra.mxu0 %v4502_v24  ;;  %v4524_v24 = vld [vmem:[#allocation10 + $0x70] sm:$0xff]  }
0x11b6   : > { %4180 = vmatprep.subr.bf16.mxu0 %v4947_v35 }
0x11b8   : > { %v2486_v28 = vpop.f32.mrb[24].mxu0 }
0x11b9   : > { %v2487_v29 = vadd.f32 %v2486_v28, %v5513_v34  ;;  %v4146_v30 = vpop.f32.mrb[25].mxu0  ;;  %v4505_v28 = vld [vmem:[%s6030_s9 + $0x58] sm:$0xff]  }
0x11ba   : > { %v2489_v31 = vpop.f32.mrb[26].mxu0  ;;  %v4507_v30 = vld [vmem:[%s6030_s9 + $0x68] sm:$0xff]  }
0x11bb   : > { %v4147_v36 = vpop.f32.mrb[27].mxu0  ;;  %v2492_v37 = vsel %vm1186_vm2, %v2487_v29, -inf  ;;  %v4508_v31 = vld [vmem:[%s6030_s9 + $0x70] sm:$0xff]  }
0x11bc   : > { %2493 = vmax.xlane.f32.xlu0 %v2492_v37  ;;  %v4509_v36 = vld [vmem:[%s6030_s9 + $0x78] sm:$0xff]  }
0x11c0   : > { %v2585_v38 = vpop.f32.mrb[28].mxu0 }
0x11c1   : > { %v2586_v39 = vadd.f32 %v2585_v38, %v5513_v34  ;;  %v4158_v40 = vpop.f32.mrb[29].mxu0 }
0x11c2   : > { %v2588_v41 = vpop.f32.mrb[30].mxu0 }
0x11c3   : > { %v4159_v42 = vpop.f32.mrb[31].mxu0  ;;  %v2591_v43 = vsel %vm1186_vm2, %v2586_v39, -inf }
0x11c4   : > { %2592 = vmax.xlane.f32.xlu1 %v2591_v43 }
0x11c8   : > { %v2684_v44 = vpop.f32.mrb[32].mxu0 }
0x11c9   : > { %v2685_v45 = vadd.f32 %v2684_v44, %v5513_v34  ;;  %v4170_v46 = vpop.f32.mrb[33].mxu0 }
0x11ca   : > { %v2687_v47 = vpop.f32.mrb[34].mxu0 }
0x11cb   : > { %v4171_v51 = vpop.f32.mrb[35].mxu0  ;;  %v2690_v52 = vsel %vm1186_vm2, %v2685_v45, -inf }
0x11cc   : > { %2691 = vmax.xlane.f32.xlu0 %v2690_v52 }
0x1241   : > { %v2393_v55 = vpop.xlane.xlu1 %2392 }
0x1242   : > { %v2394_v20 = vsub.f32 %v2386_v21, %v2393_v55 }
0x1244   : > { %v2395_v57 = vmul.f32 1.442695, %v2394_v20 }
0x1246   : > { %4600 = vpow2.f32 %v2395_v57 }
0x1249   : > { %v2494_v58 = vpop.xlane.xlu0 %2493 }
0x124a   : > { %v2495_v60 = vsub.f32 %v2487_v29, %v2494_v58  ;;  %v4506_v29 = vld [vmem:[%s6030_s9 + $0x60] sm:$0xff]  }
0x124c   : > { %v2496_v61 = vmul.f32 1.442695, %v2495_v60 }
0x124e   : > { %4602 = vpow2.f32 %v2496_v61 }
0x1250   : > { %v4601_v48 = vpop.eup %4600 }
0x1251   : > { %v2593_v62 = vpop.xlane.xlu1 %2592  ;;  %v2397_v63 = vsel %vm1186_vm2, %v4601_v48, 0.0 }
0x1252   : > { %v2594_v54 = vsub.f32 %v2586_v39, %v2593_v62  ;;  %2398 = vadd.xlane.f32.xlu1 %v2397_v63 }
0x1254   : > { %v2595_v34 = vmul.f32 1.442695, %v2594_v54 }
0x1256   : > { %4604 = vpow2.f32 %v2595_v34  ;;  %v3790_v34 = vld [vmem:[%s6031_s10 + $0x1] ss:$0 sm:$0xff] }
0x1258   : > { %v4603_v56 = vpop.eup %4602 }
0x1259   : > { %v2692_v9 = vpop.xlane.xlu0 %2691  ;;  %v2498_v1 = vsel %vm1186_vm2, %v4603_v56, 0.0 }
0x125a   : > { %v2693_v2 = vsub.f32 %v2685_v45, %v2692_v9  ;;  %2499 = vadd.xlane.f32.xlu0 %v2498_v1 }
0x125c   : > { %v2694_v33 = vmul.f32 1.442695, %v2693_v2 }
0x125e   : > { %4606 = vpow2.f32 %v2694_v33 }
0x1260   : > { %v4605_v3 = vpop.eup %4604 }
0x1261   : > { %v2597_v4 = vsel %vm1186_vm2, %v4605_v3, 0.0 }
0x1262   : > { %2598 = vadd.xlane.f32.xlu1 %v2597_v4 }
0x1268   : > { %v4607_v5 = vpop.eup %4606 }
0x1269   : > { %v2696_v6 = vsel %vm1186_vm2, %v4607_v5, 0.0 }
0x126a   : > { %2697 = vadd.xlane.f32.xlu0 %v2696_v6  ;;  %v4514_v6 = vld [vmem:[%s6033_s12 + $0x60] sm:$0xff]  }
0x12df   : > { %v2399_v7 = vpop.xlane.xlu1 %2398 }
0x12e0   : > { %4608 = vrcp.f32 %v2399_v7  ;;  %v4516_v7 = vld [vmem:[%s6033_s12 + $0x70] sm:$0xff]  }
0x12e7   : > { %v2500_v8 = vpop.xlane.xlu0 %2499 }
0x12e8   : > { %4610 = vrcp.f32 %v2500_v8  ;;  %v4517_v8 = vld [vmem:[%s6033_s12 + $0x78] sm:$0xff]  }
0x12ea   : > { %v4609_v12 = vpop.eup %4608 }
0x12eb   : > { %v2401_v13 = vmul.f32 %v4609_v12, %v4601_v48 }
0x12ed   : > { %v2402_v14 = vpack.c.bf16 %v2401_v13, %v2401_v13 }
0x12ef   : > { %4139 = vmatmul.mubr.msk.bf16.vlgmr.msra.gmra.mrb[48].mxu1 %vm1186_vm2, %v2402_v14  ;;  %v2599_v10 = vpop.xlane.xlu1 %2598 }
0x12f0   : > { %4149 = vmatpush3.bf16.msra.mxu1 %v5822_v15  ;;  %4612 = vrcp.f32 %v2599_v10  ;;  %4150 = vmatprep.mubr.msk.bf16.mxu1 %vm4948_vm0, %v4947_v35 }
0x12f1   : > { %4160 = vmatprep.subr.bf16.mxu1 %v4947_v35 }
0x12f2   : > { %v4611_v53 = vpop.eup %4610 }
0x12f3   : > { %v2502_v59 = vmul.f32 %v4611_v53, %v4603_v56  ;;  %v3799_v53 = vld [vmem:[#allocation8 + $0x1] ss:$0 sm:$0xff] }
0x12f5   : > { %v2503_v0 = vpack.c.bf16 %v2502_v59, %v2502_v59 }
0x12f7   : > { %4151 = vmatmul.mubr.msk.bf16.vlgmr.msra.gmra.mrb[52].mxu1 %vm1186_vm2, %v2503_v0  ;;  %v2698_v11 = vpop.xlane.xlu0 %2697 }
0x12f8   : > { %4161 = vmatpush3.bf16.msra.mxu1 %v5822_v15  ;;  %4614 = vrcp.f32 %v2698_v11  ;;  %4162 = vmatprep.mubr.msk.bf16.mxu1 %vm4948_vm0, %v4947_v35 }
0x12f9   : > { %4172 = vmatprep.subr.bf16.mxu1 %v4947_v35 }
0x12fa   : > { %v4613_v16 = vpop.eup %4612 }
0x12fb   : > { %v2601_v18 = vmul.f32 %v4613_v16, %v4605_v3  ;;  %v4518_v16 = vld [vmem:[#allocation10 + $0x40] sm:$0xff]  }
0x12fd   : > { %v2602_v19 = vpack.c.bf16 %v2601_v18, %v2601_v18  ;;  %v4519_v18 = vld [vmem:[#allocation10 + $0x48] sm:$0xff]  }
0x12ff   : > { %4163 = vmatmul.mubr.msk.bf16.vlgmr.msra.gmra.mrb[56].mxu1 %vm1186_vm2, %v2602_v19  ;;  %v4520_v19 = vld [vmem:[#allocation10 + $0x50] sm:$0xff]  }
0x1300   : > { %4173 = vmatpush3.bf16.msra.mxu1 %v5822_v15  ;;  %4174 = vmatprep.mubr.msk.bf16.mxu1 %vm4948_vm0, %v4947_v35  ;;  %v4503_v15 = vld [vmem:[%s6030_s9 + $0x48] sm:$0xff]  }
0x1301   : > { %4198 = vmatprep.subr.bf16.mxu1 %v4947_v35  ;;  %4181 = vmatpush3.bf16.msra.mxu0 %v4503_v15  ;;  %v4525_v15 = vld [vmem:[#allocation10 + $0x78] sm:$0xff]  }
0x1302   : > { %v4615_v21 = vpop.eup %4614  ;;  %4182 = vmatprep.subr.bf16.mxu0 %v4947_v35 }
0x1303   : > { %v2700_v22 = vmul.f32 %v4615_v21, %v4607_v5  ;;  %v4513_v5 = vld [vmem:[%s6033_s12 + $0x58] sm:$0xff]   ;;  %v4521_v21 = vld [vmem:[#allocation10 + $0x58] sm:$0xff]  }
0x1305   : > { %v2701_v23 = vpack.c.bf16 %v2700_v22, %v2700_v22  ;;  %4183 = vmatpush3.bf16.msra.mxu0 %v4504_v25  ;;  %v4522_v22 = vld [vmem:[#allocation10 + $0x60] sm:$0xff]   ;;  %v3817_v25 = vld [vmem:[%s6034_s13 + $0x1] ss:$0 sm:$0xff] }
0x1306   : > { %4184 = vmatprep.subr.bf16.mxu0 %v4947_v35 }
0x1307   : > { %4175 = vmatmul.mubr.msk.bf16.vlgmr.msra.gmra.mrb[60].mxu1 %vm1186_vm2, %v2701_v23  ;;  %v4523_v23 = vld [vmem:[#allocation10 + $0x68] sm:$0xff]  }
0x1308   : > { %4214 = vmatprep.mubr.msk.bf16.mxu1 %vm4948_vm0, %v4947_v35 }
0x1309   : > { %4185 = vmatpush3.bf16.msra.mxu0 %v4505_v28 }
0x130a   : > { %4186 = vmatprep.subr.bf16.mxu0 %v4947_v35 }
0x130d   : > { %4187 = vmatpush3.bf16.msra.mxu0 %v4506_v29 }
0x130e   : > { %4188 = vmatprep.subr.bf16.mxu0 %v4947_v35 }
0x1311   : > { %4189 = vmatpush3.bf16.msra.mxu0 %v4507_v30 }
0x1312   : > { %4190 = vmatprep.subr.bf16.mxu0 %v4947_v35 }
0x1315   : > { %4191 = vmatpush3.bf16.msra.mxu0 %v4508_v31 }
0x1316   : > { %4192 = vmatprep.subr.bf16.mxu0 %v4947_v35 }
0x1319   : > { %4193 = vmatpush3.bf16.msra.mxu0 %v4509_v36 }
0x131a   : > { %4218 = vmatprep.subr.bf16.mxu0 %v4947_v35 }
0x13c2   : > { %v2443_v37 = vpop.f32.mrb[48].mxu1 }
0x13c3   : > { %v4140_v38 = vpop.f32.mrb[49].mxu1  ;;  %v2449_v42 = vmul.f32 %v2443_v37, %v5498_v26 }
0x13c4   : > { %v2446_v39 = vpop.f32.mrb[50].mxu1 }
0x13c5   : > { %v4141_v40 = vpop.f32.mrb[51].mxu1 }
0x13ca   : > { %v2541_v41 = vpop.f32.mrb[52].mxu1 }
0x13cb   : > { %v2547_v43 = vmul.f32 %v2541_v41, %v5520_v50  ;;  %v4152_v44 = vpop.f32.mrb[53].mxu1  ;;  %v4510_v50 = vld [vmem:[%s6033_s12 + $0x40] sm:$0xff]  }
0x13cc   : > { %v2544_v45 = vpop.f32.mrb[54].mxu1  ;;  %4199 = vmatpush3.bf16.msra.mxu1 %v4510_v50 }
0x13cd   : > { %v2548_v46 = vadd.f32 %v2547_v43, %v2449_v42  ;;  %v4153_v47 = vpop.f32.mrb[55].mxu1  ;;  %4200 = vmatprep.subr.bf16.mxu1 %v4947_v35  ;;  %v3836_v43 = vld [vmem:[%s6036_s15 + $0x1] ss:$0 sm:$0xff] }
0x13d2   : > { %v2640_v51 = vpop.f32.mrb[56].mxu1 }
0x13d3   : > { %v2646_v52 = vmul.f32 %v2640_v51, %v5538_v17  ;;  %v4164_v55 = vpop.f32.mrb[57].mxu1  ;;  %v4511_v17 = vld [vmem:[%s6033_s12 + $0x48] sm:$0xff]  }
0x13d4   : > { %v2643_v20 = vpop.f32.mrb[58].mxu1  ;;  %4201 = vmatpush3.bf16.msra.mxu1 %v4511_v17  ;;  %v4528_v55 = vld [vmem:[#allocation14 + $0x4] ss:$16 sps:$4 sm:$0xff]  }
0x13d5   : > { %v2647_v57 = vadd.f32 %v2646_v52, %v2548_v46  ;;  %v4165_v58 = vpop.f32.mrb[59].mxu1  ;;  %4202 = vmatprep.subr.bf16.mxu1 %v4947_v35  ;;  %v4526_v52 = vld [vmem:[#allocation14] ss:$16 sps:$4 sm:$0xff]   ;;  %v4529_v20 = vld [vmem:[#allocation14 + $0x8] ss:$16 sps:$4 sm:$0xff]  }
0x13d6   : > { %v4534_v58 = vld [vmem:[#allocation14 + $0x24] ss:$16 sps:$4 sm:$0xff]  }
0x13d7   : > { %v3837_v17 = vld [vmem:[%s6098_s0] ss:$0 sm:$0xff] }
0x13da   : > { %v2739_v60 = vpop.f32.mrb[60].mxu1 }
0x13db   : > { %v2745_v61 = vmul.f32 %v2739_v60, %v5558_v49  ;;  %v4176_v48 = vpop.f32.mrb[61].mxu1  ;;  %v4512_v49 = vld [vmem:[%s6033_s12 + $0x50] sm:$0xff]  }
0x13dc   : > { %v2742_v62 = vpop.f32.mrb[62].mxu1  ;;  %4203 = vmatpush3.bf16.msra.mxu1 %v4512_v49  ;;  %v4537_v60 = vld [vmem:[#allocation14 + $0x2c] ss:$16 sps:$4 sm:$0xff]   ;;  %v4540_v48 = vld [vmem:[#allocation14 + $0x44] ss:$16 sps:$4 sm:$0xff]  }
0x13dd   : > { %v2746_v63 = vadd.f32 %v2745_v61, %v2647_v57  ;;  %v4177_v26 = vpop.f32.mrb[63].mxu1  ;;  %4204 = vmatprep.subr.bf16.mxu1 %v4947_v35  ;;  %v4531_v57 = vld [vmem:[#allocation14 + $0xc] ss:$16 sps:$4 sm:$0xff]   ;;  %v4535_v61 = vld [vmem:[#allocation14 + $0x28] ss:$16 sps:$4 sm:$0xff]  }
0x13de   : > { %v4543_v62 = vld [vmem:[#allocation14 + $0x4c] ss:$16 sps:$4 sm:$0xff]   ;;  %v4541_v26 = vld [vmem:[#allocation14 + $0x48] ss:$16 sps:$4 sm:$0xff]  }
0x13df   : > { %v2747_v54 = vpack.c.bf16 %v2746_v63, %v2746_v63  ;;  %v4538_v63 = vld [vmem:[#allocation14 + $0x40] ss:$16 sps:$4 sm:$0xff]  }
0x13e0   : > { %4205 = vmatpush3.bf16.msra.mxu1 %v4513_v5  ;;  %v4550_v5 = vld [vmem:[#allocation14 + $0x80] ss:$16 sps:$4 sm:$0xff]  }
0x13e1   : > { %4195 = vmatmul.mubr.bf16.vlgmr.msra.gmra.mrb[36].mxu0 %v2747_v54  ;;  %4206 = vmatprep.subr.bf16.mxu1 %v4947_v35 }
0x13e2   : > { %4234 = vmatprep.mubr.msk.bf16.mxu0 %vm4948_vm0, %v4947_v35  ;;  %4219 = vmatpush3.bf16.msra.mxu0 %v4518_v16  ;;  %v4571_v16 = vld [vmem:[#allocation14 + $0xe8] ss:$16 sps:$4 sm:$0xff]  }
0x13e3   : > { %4220 = vmatprep.subr.bf16.mxu0 %v4947_v35 }
0x13e4   : > { %4207 = vmatpush3.bf16.msra.mxu1 %v4514_v6  ;;  %v4553_v6 = vld [vmem:[#allocation14 + $0x88] ss:$16 sps:$4 sm:$0xff]  }
0x13e5   : > { %4208 = vmatprep.subr.bf16.mxu1 %v4947_v35 }
0x13e6   : > { %4221 = vmatpush3.bf16.msra.mxu0 %v4519_v18 }
0x13e7   : > { %4222 = vmatprep.subr.bf16.mxu0 %v4947_v35 }
0x13ea   : > { %4223 = vmatpush3.bf16.msra.mxu0 %v4520_v19 }
0x13eb   : > { %4224 = vmatprep.subr.bf16.mxu0 %v4947_v35 }
0x13ee   : > { %4225 = vmatpush3.bf16.msra.mxu0 %v4521_v21 }
0x13ef   : > { %4226 = vmatprep.subr.bf16.mxu0 %v4947_v35 }
0x13f2   : > { %4227 = vmatpush3.bf16.msra.mxu0 %v4522_v22 }
0x13f3   : > { %4228 = vmatprep.subr.bf16.mxu0 %v4947_v35 }
0x13f6   : > { %4229 = vmatpush3.bf16.msra.mxu0 %v4523_v23  ;;  %v3838_v23 = vld [vmem:[#allocation11] ss:$0 sm:$0xff] }
0x13f7   : > { %4230 = vmatprep.subr.bf16.mxu0 %v4947_v35 }
0x13fa   : > { %4231 = vmatpush3.bf16.msra.mxu0 %v4524_v24 }
0x13fb   : > { %4232 = vmatprep.subr.bf16.mxu0 %v4947_v35 }
0x13fe   : > { %4233 = vmatpush3.bf16.msra.mxu0 %v4525_v15  ;;  %v3839_v15 = vld [vmem:[#allocation13] ss:$0 sm:$0xff] }
0x13ff   : > { %3384 = vmatprep.subr.bf16.mxu0 %v4531_v57 }
0x14b4   : > { %v2855_v56 = vpop.f32.mrb[36].mxu0 }
0x14b5   : > { %v2856_v9 = vadd.f32 %v3790_v34, %v2855_v56  ;;  %v4196_v1 = vpop.f32.mrb[37].mxu0 }
0x14b6   : > { %v2858_v2 = vpop.f32.mrb[38].mxu0  ;;  %v4549_v1 = vld [vmem:[#allocation14 + $0x6c] ss:$16 sps:$4 sm:$0xff]  }
0x14b7   : > { %v5931_v33 = vadd.f32 %v2856_v9, %v5705_v27  ;;  %v4197_v3 = vpop.f32.mrb[39].mxu0  ;;  %v4515_v27 = vld [vmem:[%s6033_s12 + $0x68] sm:$0xff]  }
0x14b8   : > { %4209 = vmatpush3.bf16.msra.mxu1 %v4515_v27  ;;  %v4546_v9 = vld [vmem:[#allocation14 + $0x64] ss:$16 sps:$4 sm:$0xff]   ;;  %v4544_v2 = vld [vmem:[#allocation14 + $0x60] ss:$16 sps:$4 sm:$0xff]  }
0x14b9   : > { %v2862_v4 = vmul.f32 %v5931_v33, %v5931_v33  ;;  %4210 = vmatprep.subr.bf16.mxu1 %v4947_v35  ;;  %v4552_v3 = vld [vmem:[#allocation14 + $0x84] ss:$16 sps:$4 sm:$0xff]  }
0x14ba   : > { %v4558_v27 = vld [vmem:[#allocation14 + $0xa4] ss:$16 sps:$4 sm:$0xff]  }
0x14bb   : > { %2863 = vadd.xlane.f32.xlu1 %v2862_v4  ;;  %v4555_v4 = vld [vmem:[#allocation14 + $0x8c] ss:$16 sps:$4 sm:$0xff]  }
0x14bc   : > { %4211 = vmatpush3.bf16.msra.mxu1 %v4516_v7  ;;  %v4561_v7 = vld [vmem:[#allocation14 + $0xac] ss:$16 sps:$4 sm:$0xff]  }
0x14bd   : > { %4212 = vmatprep.subr.bf16.mxu1 %v4947_v35 }
0x14c0   : > { %4213 = vmatpush3.bf16.msra.mxu1 %v4517_v8  ;;  %v4556_v8 = vld [vmem:[#allocation14 + $0xa0] ss:$16 sps:$4 sm:$0xff]  }
0x14c1   : > { %3343 = vmatprep.subr.bf16.mxu1 %v4528_v55 }
0x1548   : > { %v2864_v12 = vpop.xlane.xlu1 %2863 }
0x1549   : > { %v2865_v13 = vmul.f32 0.03125, %v2864_v12  ;;  %v4559_v12 = vld [vmem:[#allocation14 + $0xa8] ss:$16 sps:$4 sm:$0xff]  }
0x154b   : > { %v2866_v14 = vadd.f32 1.1920929e-07, %v2865_v13  ;;  %v4564_v13 = vld [vmem:[#allocation14 + $0xc4] ss:$16 sps:$4 sm:$0xff]  }
0x154d   : > { %4616 = vrsqrt.f32 %v2866_v14  ;;  %v4567_v14 = vld [vmem:[#allocation14 + $0xcc] ss:$16 sps:$4 sm:$0xff]  }
0x1557   : > { %v4617_v10 = vpop.eup %4616 }
0x1558   : > { %v2868_v59 = vmul.f32 %v4617_v10, %v5931_v33  ;;  %v4562_v10 = vld [vmem:[#allocation14 + $0xc0] ss:$16 sps:$4 sm:$0xff]  }
0x155a   : > { %v2877_v0 = vmul.f32 %v3799_v53, %v2868_v59  ;;  %v4565_v53 = vld [vmem:[#allocation14 + $0xc8] ss:$16 sps:$4 sm:$0xff]   ;;  %v4570_v59 = vld [vmem:[#allocation14 + $0xe4] ss:$16 sps:$4 sm:$0xff]  }
0x155c   : > { %v2878_v11 = vpack.c.bf16 %v2877_v0, %v2877_v0  ;;  %v4573_v0 = vld [vmem:[#allocation14 + $0xec] ss:$16 sps:$4 sm:$0xff]  }
0x155e   : > { %4215 = vmatmul.mubr.bf16.vlgmr.msra.gmra.mrb[64].mxu1 %v2878_v11  ;;  %v4568_v11 = vld [vmem:[#allocation14 + $0xe0] ss:$16 sps:$4 sm:$0xff]  }
0x155f   : > { %3375 = vmatprep.mubr.bf16.mxu1 %v4946_v32  ;;  %3344 = vmatpush1.bf16.msra.mxu1 %v4526_v52 }
0x1560   : > { %3345 = vmatprep.subr.bf16.mxu1 %v4534_v58 }
0x1631   : > { %v2986_v28 = vpop.f32.mrb[64].mxu1 }
0x1632   : > { %v2987_v29 = vadd.f32 %v3817_v25, %v2986_v28  ;;  %v4216_v30 = vpop.f32.mrb[65].mxu1 }
0x1633   : > { %v2989_v31 = vpop.f32.mrb[66].mxu1 }
0x1634   : > { %v3826_v36 = vmul.f32 -1.442695, %v2987_v29  ;;  %v4217_v37 = vpop.f32.mrb[67].mxu1 }
0x1636   : > { %4618 = vpow2.f32 %v3826_v36 }
0x1640   : > { %v4619_v38 = vpop.eup %4618 }
0x1641   : > { %v2995_v39 = vadd.f32 1.0, %v4619_v38 }
0x1643   : > { %4620 = vrcp.f32 %v2995_v39 }
0x164d   : > { %v4621_v40 = vpop.eup %4620 }
0x164e   : > { %v2998_v41 = vmul.f32 %v4621_v40, %v2987_v29 }
0x1650   : > { %v2999_v42 = vpack.c.bf16 %v2998_v41, %v2998_v41 }
0x1652   : > { %4235 = vmatmul.mubr.bf16.vlgmr.msra.gmra.mrb[40].mxu0 %v2999_v42 }
0x1653   : > { %3416 = vmatprep.mubr.bf16.mxu0 %v4946_v32  ;;  %v4532_v32 = vld [vmem:[#allocation14 + $0x20] ss:$16 sps:$4 sm:$0xff]   ;;  %3385 = vmatpush1.bf16.msra.mxu0 %v4529_v20 }
0x1654   : > { %3386 = vmatprep.subr.bf16.mxu0 %v4537_v60  ;;  %3346 = vmatpush1.bf16.msra.mxu1 %v4532_v32 }
0x1655   : > { %3347 = vmatprep.subr.bf16.mxu1 %v4540_v48 }
0x1657   : > { %3387 = vmatpush1.bf16.msra.mxu0 %v4535_v61 }
0x1658   : > { %3388 = vmatprep.subr.bf16.mxu0 %v4543_v62  ;;  %3348 = vmatpush1.bf16.msra.mxu1 %v4538_v63 }
0x1659   : > { %3349 = vmatprep.subr.bf16.mxu1 %v4546_v9 }
0x165b   : > { %3389 = vmatpush1.bf16.msra.mxu0 %v4541_v26 }
0x165c   : > { %3390 = vmatprep.subr.bf16.mxu0 %v4549_v1  ;;  %3350 = vmatpush1.bf16.msra.mxu1 %v4544_v2 }
0x165d   : > { %3351 = vmatprep.subr.bf16.mxu1 %v4552_v3 }
0x1660   : > { %3352 = vmatpush1.bf16.msra.mxu1 %v4550_v5 }
0x1661   : > { %3353 = vmatprep.subr.bf16.mxu1 %v4558_v27 }
0x1664   : > { %3354 = vmatpush1.bf16.msra.mxu1 %v4556_v8 }
0x1665   : > { %3355 = vmatprep.subr.bf16.mxu1 %v4564_v13 }
0x1668   : > { %3356 = vmatpush1.bf16.msra.mxu1 %v4562_v10 }
0x1669   : > { %3357 = vmatprep.subr.bf16.mxu1 %v4570_v59 }
0x166c   : > { %3358 = vmatpush1.bf16.msra.mxu1 %v4568_v11 }
0x1725   : > { %v3099_v35 = vpop.f32.mrb[40].mxu0 }
0x1726   : > { %v3105_v44 = vadd.f32 %v3099_v35, %v5931_v33  ;;  %v4236_v45 = vpop.f32.mrb[41].mxu0  ;;  %v4547_v33 = vld [vmem:[#allocation14 + $0x68] ss:$16 sps:$4 sm:$0xff]  }
0x1727   : > { %v3102_v46 = vpop.f32.mrb[42].mxu0  ;;  %3391 = vmatpush1.bf16.msra.mxu0 %v4547_v33 }
0x1728   : > { %v4237_v47 = vpop.f32.mrb[43].mxu0  ;;  %v3114_v51 = vadd.f32 %v3836_v43, %v3105_v44  ;;  %3392 = vmatprep.subr.bf16.mxu0 %v4555_v4 }
0x172a   : > { %3116 = vadd.xlane.f32.xlu0 %v3114_v51 }
0x172b   : > { %3393 = vmatpush1.bf16.msra.mxu0 %v4553_v6 }
0x172c   : > { %3394 = vmatprep.subr.bf16.mxu0 %v4561_v7 }
0x172f   : > { %3395 = vmatpush1.bf16.msra.mxu0 %v4559_v12 }
0x1730   : > { %3396 = vmatprep.subr.bf16.mxu0 %v4567_v14 }
0x1733   : > { %3397 = vmatpush1.bf16.msra.mxu0 %v4565_v53 }
0x1734   : > { %3398 = vmatprep.subr.bf16.mxu0 %v4573_v0 }
0x1737   : > { %3399 = vmatpush1.bf16.msra.mxu0 %v4571_v16 }
0x17b7   : > { %v3117_v54 = vpop.xlane.xlu0 %3116 }
0x17b8   : > { %v3118_v50 = vmul.f32 0.03125, %v3117_v54 }
0x17ba   : > { %v3119_v49 = vsub.f32 %v3114_v51, %v3118_v50 }
0x17bc   : > { %v3126_v34 = vmul.f32 %v3837_v17, %v3119_v49 }
0x17be   : > { %v3127_v56 = vmul.f32 %v3126_v34, %v3126_v34 }
0x17c0   : > { %3128 = vadd.xlane.f32.xlu1 %v3127_v56 }
0x184d   : > { %v3129_v18 = vpop.xlane.xlu1 %3128 }
0x184e   : > { %v3130_v19 = vmul.f32 0.03125, %v3129_v18 }
0x1850   : > { %v3131_v21 = vadd.f32 1e-05, %v3130_v19 }
0x1852   : > { %4622 = vrsqrt.f32 %v3131_v21 }
0x185c   : > { %v4623_v22 = vpop.eup %4622 }
0x185d   : > { %v3133_v24 = vmul.f32 %v4623_v22, %v3126_v34 }
0x185f   : > { %v3141_v25 = vmul.f32 %v3838_v23, %v3133_v24 }
0x1861   : > { %v3149_v28 = vadd.f32 %v3839_v15, %v3141_v25 }
0x1863   : > { %v3150_v29 = vpack.c.bf16 %v3149_v28, %v3149_v28 }
0x1865   : > { %3376 = vmatmul.mubr.bf16.vlgmr.msra.gmra.mrb[68].mxu1 %v3150_v29  ;;  %3417 = vmatmul.mubr.bf16.vlgmr.msra.gmra.mrb[44].mxu0 %v3150_v29 }
0x1938   : > { %v3377_v30 = vpop.f32.mrb[68].mxu1  ;;  %v3418_v31 = vpop.f32.mrb[44].mxu0 }
0x1939   : > { %3425 = vst [vmem:[%s700_s28] sm:$0xff] %v3377_v30  ;;  %3427 = vst [vmem:[%s700_s28 + $0x10] sm:$0xff] %v3418_v31  ;;  %v3379_v36 = vpop.f32.mrb[69].mxu1  ;;  %v3420_v37 = vpop.f32.mrb[45].mxu0 }
0x193a   : > { %3426 = vst [vmem:[%s700_s28 + $0x8] sm:$0xff] %v3379_v36  ;;  %3428 = vst [vmem:[%s700_s28 + $0x18] sm:$0xff] %v3420_v37  ;;  %v3381_v38 = vpop.f32.mrb[70].mxu1  ;;  %v3422_v39 = vpop.f32.mrb[46].mxu0 }
0x193b   : > { %v3382_v40 = vpop.f32.mrb[71].mxu1  ;;  %v3423_v41 = vpop.f32.mrb[47].mxu0 }
0x193c   : > { %4862 = shalt.err (!%p4859_p9)
}
0x193d   : > { %s4863_s26 = scalar_lea.hbm %s5981_s27, 512  ;;  %s4867_s11 = scalar_lea.hbm %s6101_s4, 1024 }
0x193e   : > { %p4864_p12 = scmp.ne.s32.totalorder %s5981_s27, %s4863_s26  ;;  %p4868_p3 = scmp.lt.u32.totalorder %s5981_s27, %s6101_s4 }
0x193f   : > { %p4869_p4 = scmp.lt.u32.totalorder %s4867_s11, %s4863_s26  ;;  %p4871_p8 = scmp.lt.u32.totalorder %s4863_s26, %s5981_s27 }
0x1940   : > { %p4865_p10 = pnand %p4864_p12, %p6102_p11 }
0x1941   : > { %p4870_p7 = por %p4869_p4, %p4868_p3 }
0x1942   : > { %p4866_p2 = pneg %p4865_p10 }
0x1943   : > { %p4872_p13 = por %p4871_p8, %p4870_p7 }
0x1945   : > { %p4873_p0 = pnand %p4872_p13, %p4866_p2 }
0x1947   : > { %4876 = shalt.err (!%p4873_p0)
}
0x1948   : > { %4270 = dma.vmem_to_hbm [thread:$0]  (%p6102_p11), %s5976_s20, 512, %s5981_s27, %s3430_s1  }
0x1949 PF: > { %s6103_s21 = sld [smem:[#allocation26_spill]]  ;;  %s6104_s5 = sld [smem:[#allocation23_spill]] }
0x194a   : > { %s6105_s3 = sld [smem:[#allocation30_spill]] }
0x194f   : > { %p4317_p1 = scmp.ge.s32.totalorder %s6103_s21, 2  ;;  %s3456_s24 = sand.u32 1, %s6104_s5  }
0x1950   : > { %p6106_p6 = scmp.ne.s32.totalorder %s6105_s3, 0  ;;  %s3457_s22 = scalar_lea.sflag [#allocation4], %s3456_s24 }
0x1952   : > { %p4298_p5 = pnand %p4317_p1, %p6106_p6 }
0x1954   : > { %4914 = dma.done.wait (!%p4298_p5), %s3457_s22, 512  }
0x1955   : > { %4916 = vsyncadd (!%p4298_p5), %s3457_s22, 4294966784  ;;  %s6107_s21 = sld [smem:[#allocation27_spill]]  ;;  %s6108_s0 = sld [smem:[#allocation24_spill]] }
0x1956   : > { %s6109_s30 = sld [smem:[#allocation25_spill]]  ;;  %s6110_s20 = sld [smem:[#allocation28_spill]] }
0x195b   : > { %p34_p9 = scmp.ge.s32.totalorder %s6107_s21, 4  }
0x195d   :  { %36 = sbr.rel (!%p34_p9) target bundleno = 17 (0x11), region = 174 }
0x1964   :  { %3462 = vsyncpa [#allocation3], 1 }
0x1965   :  { %3464 = vsyncpa [#allocation3 + $0x1], 1 }
0x1966   :  { %3465 = vsyncpa [#allocation6], 1 }
0x1967   :  { %3466 = vsyncpa [#allocation9], 1 }
0x1968   :  { %3467 = vsyncpa [#allocation12], 1 }
0x1969   :  { %3468 = vsyncpa [#allocation15], 1 }
0x196a   :  { %3469 = vsyncpa [#allocation4], 1 }
0x196b   :  { %3471 = vsyncpa [#allocation4 + $0x1], 1 }

</bundles_post_ra>
